<compile_context>
chip_gen: v7x
topology: tpu7x:2x2x1
jax: 0.10.0
libtpu: 0.0.40
codegen_flags: <defaults>
</compile_context>

<pallas_src>
import jax
import jax.numpy as jnp
from jax.experimental import pallas as pl
from jax.experimental.pallas import tpu as pltpu

LANES = 128
SUBLANES = 8
UNIT = SUBLANES * LANES   # 1024 elements == one full f32 (8,128) vreg plane


def _cdiv(a, b):
    return -(-a // b)


def _detect_num_tensorcores():
    """Best-effort TensorCore count (2 on v7x, 1 on v5e/v6e). Never raises."""
    try:
        info = pltpu.get_tpu_info()
        for name in ("num_cores", "num_tensorcores", "tensorcores_per_chip",
                     "cores_per_chip"):
            val = getattr(info, name, None)
            if val:
                return max(1, min(2, int(val)))
    except Exception:
        pass
    return 1


def polarnet_kernel(w1_ref, b1_ref, w2_ref, b2_ref, x_ref, o_ref):
    # x_ref: (2, tile_rows, 128) VMEM block -- batch on (sublane, lane).
    xr = x_ref[0]                       # (tile_rows, 128) cartesian x
    yr = x_ref[1]                       # (tile_rows, 128) cartesian y

    # cartesian -> polar, full-vreg per-element math (EUP/VPU).
    r = jnp.sqrt(xr * xr + yr * yr)
    a = jnp.arctan2(yr, xr)

    # fc1 -> tanh -> fc2 as a fully-unrolled accumulation over hidden units.
    # Weights are scalars in SMEM (sreg splat), so live vector state is just
    # {r, a, acc, one temp} regardless of H or tile size.
    num_hid = b1_ref.shape[0]
    acc = jnp.full_like(r, b2_ref[0])   # start from the fc2 bias
    for h in range(num_hid):            # static full unroll (H is small)
        pre = r * w1_ref[0, h] + a * w1_ref[1, h] + b1_ref[h]
        acc = acc + jnp.tanh(pre) * w2_ref[h]

    # Exact sigmoid via tanh: one EUP op, output strictly in [0, 1].
    o_ref[...] = (0.5 * (jnp.tanh(0.5 * acc) + 1.0)).astype(o_ref.dtype)


def polarnet_forward(x, w1, b1, w2, b2, *, tile_n=32768):
    """x: (N, 2) float32 (PyTorch layout). Returns (N, 1) float32."""
    n, two = x.shape
    assert two == 2
    num_hid = w1.shape[1]

    # ---- generation-aware tile selection (units of one 1024-elem plane) ----
    units = _cdiv(n, UNIT)
    tile_units = min(max(1, tile_n // UNIT), units)
    ncores = _detect_num_tensorcores()
    if ncores > 1 and units >= ncores:
        # v7x: keep >= ncores grid steps so the "parallel" batch axis shards
        # across TensorCores.  On 1-TC chips a single big tile wins.
        # TODO(synk): consider pltpu.CORE_PARALLEL / core_map on v7x if plain
        # "parallel" does not actually shard across the two TensorCores.
        tile_units = min(tile_units, _cdiv(units, ncores))
    grid_steps = _cdiv(units, tile_units)
    tile_units = _cdiv(units, grid_steps)       # rebalance -> minimal padding
    padded_n = grid_steps * tile_units * UNIT
    tile_rows = tile_units * SUBLANES

    # ---- host-side layout plumbing: batch -> (sublane, lane) plane ---------
    # (Callers that already hold a (2, N) layout can skip this transpose.)
    # Zero padding is safe: sqrt(0)=0, arctan2(0,0)=0 -> finite, sliced off.
    xt = jnp.transpose(x).astype(jnp.float32)           # (2, N)
    if padded_n != n:
        xt = jnp.pad(xt, ((0, 0), (0, padded_n - n)))
    rows_total = padded_n // LANES
    x3d = xt.reshape(2, rows_total, LANES)

    # Small weights live in SMEM; read as scalars inside the kernel.
    w1s = w1.astype(jnp.float32)                        # (2, H)
    b1s = b1.reshape(num_hid).astype(jnp.float32)       # (H,)
    w2s = w2.reshape(num_hid).astype(jnp.float32)       # (H,)
    b2s = b2.reshape(1).astype(jnp.float32)             # (1,)

    out2d = pl.pallas_call(
        polarnet_kernel,
        out_shape=jax.ShapeDtypeStruct((rows_total, LANES), jnp.float32),
        grid_spec=pltpu.PrefetchScalarGridSpec(
            num_scalar_prefetch=0,
            grid=(grid_steps,),
            in_specs=[
                pl.BlockSpec(memory_space=pltpu.MemorySpace.SMEM),  # w1 (2,H)
                pl.BlockSpec(memory_space=pltpu.MemorySpace.SMEM),  # b1 (H,)
                pl.BlockSpec(memory_space=pltpu.MemorySpace.SMEM),  # w2 (H,)
                pl.BlockSpec(memory_space=pltpu.MemorySpace.SMEM),  # b2 (1,)
                pl.BlockSpec((2, tile_rows, LANES), lambda i: (0, i, 0)),
            ],
            out_specs=pl.BlockSpec((tile_rows, LANES), lambda i: (i, 0)),
        ),
        compiler_params=pltpu.CompilerParams(
            dimension_semantics=("parallel",)),
    )(w1s, b1s, w2s, b2s, x3d)

    return out2d.reshape(padded_n)[:n].reshape(n, 1)


def init_params(key, num_hid):
    # Deterministic init mimicking nn.Linear's U(-1/sqrt(fan_in), 1/sqrt(fan_in)).
    k1, k2, k3, k4 = jax.random.split(key, 4)
    bound1 = 1.0 / jnp.sqrt(2.0)
    bound2 = 1.0 / jnp.sqrt(float(num_hid))
    w1 = jax.random.uniform(k1, (2, num_hid), jnp.float32, -bound1, bound1)
    b1 = jax.random.uniform(k2, (1, num_hid), jnp.float32, -bound1, bound1)
    w2 = jax.random.uniform(k3, (num_hid, 1), jnp.float32, -bound2, bound2)
    b2 = jax.random.uniform(k4, (1, 1), jnp.float32, -bound2, bound2)
    return w1, b1, w2, b2


def polarnet_reference(x, w1, b1, w2, b2):
    # Pure-JAX reference of the PyTorch forward, for correctness checking.
    raw_x = x[:, 0]
    raw_y = x[:, 1]
    r = jnp.sqrt(raw_x ** 2 + raw_y ** 2).reshape(-1, 1)
    a = jnp.arctan2(raw_y, raw_x).reshape(-1, 1)
    new_input = jnp.concatenate([r, a], axis=1)
    h1 = jnp.tanh(new_input @ w1 + b1)
    h2 = h1 @ w2 + b2
    return jax.nn.sigmoid(h2)


if __name__ == "__main__":
    key = jax.random.PRNGKey(0)
    k_x, k_p = jax.random.split(key)

    num_hid = 32
    batch = 2500   # exercises padding and a multi-step grid with tile_n=1024

    x = jax.random.normal(k_x, (batch, 2), jnp.float32)
    w1, b1, w2, b2 = init_params(k_p, num_hid)

    out = jax.block_until_ready(
        polarnet_forward(x, w1, b1, w2, b2, tile_n=1024))
    ref = polarnet_reference(x, w1, b1, w2, b2)

    assert out.shape == (batch, 1)
    # Kernel math is exact (no approximate reciprocal any more); 1e-3 is
    # generous slack for Mosaic-vs-XLA transcendental approximation deltas.
    assert jnp.allclose(out, ref, atol=1e-3, rtol=1e-3), "mismatch vs reference"

    print("KERNEL_OK")
</pallas_src>

<mosaic_0001>
module attributes {stable_mosaic.version = 11 : i64} {
  func.func @polarnet_kernel(%arg0: i32, %arg1: memref<2x32xf32, #tpu.memory_space<smem>>, %arg2: memref<32xf32, #tpu.memory_space<smem>>, %arg3: memref<32xf32, #tpu.memory_space<smem>>, %arg4: memref<1xf32, #tpu.memory_space<smem>>, %arg5: memref<2x8x128xf32, #tpu.memory_space<vmem>>, %arg6: memref<8x128xf32, #tpu.memory_space<vmem>>) attributes {dimension_semantics = [#tpu.dimension_semantics<parallel>], iteration_bounds = array<i64: 3>, scalar_prefetch = 0 : i64, scratch_operands = 0 : i64, tpu.core_type = #tpu.core_type<tc>, window_params = [{transform_indices = @transform_0, window_bounds = array<i64: 2, 32>}, {transform_indices = @transform_1, window_bounds = array<i64: 32>}, {transform_indices = @transform_2, window_bounds = array<i64: 32>}, {transform_indices = @transform_3, window_bounds = array<i64: 1>}, {transform_indices = @transform_4, window_bounds = array<i64: 2, 8, 128>}, {transform_indices = @transform_5, window_bounds = array<i64: 8, 128>}]} {
    %c0 = arith.constant 0 : index
    %c0_0 = arith.constant 0 : index
    %c0_1 = arith.constant 0 : index
    %0 = vector.load %arg5[%c0, %c0_0, %c0_1] : memref<2x8x128xf32, #tpu.memory_space<vmem>>, vector<1x8x128xf32>
    %1 = vector.shape_cast %0 : vector<1x8x128xf32> to vector<8x128xf32>
    %c1 = arith.constant 1 : index
    %c0_2 = arith.constant 0 : index
    %c0_3 = arith.constant 0 : index
    %2 = vector.load %arg5[%c1, %c0_2, %c0_3] : memref<2x8x128xf32, #tpu.memory_space<vmem>>, vector<1x8x128xf32>
    %3 = vector.shape_cast %2 : vector<1x8x128xf32> to vector<8x128xf32>
    %4 = arith.mulf %1, %1 : vector<8x128xf32>
    %5 = arith.mulf %3, %3 : vector<8x128xf32>
    %6 = arith.addf %4, %5 : vector<8x128xf32>
    %7 = math.sqrt %6 : vector<8x128xf32>
    %8 = math.atan2 %3, %1 : vector<8x128xf32>
    %c0_4 = arith.constant 0 : index
    %9 = memref.load %arg4[%c0_4] : memref<1xf32, #tpu.memory_space<smem>>
    %10 = vector.broadcast %9 : f32 to vector<8x128xf32>
    %c0_5 = arith.constant 0 : index
    %c0_6 = arith.constant 0 : index
    %11 = memref.load %arg1[%c0_5, %c0_6] : memref<2x32xf32, #tpu.memory_space<smem>>
    %12 = vector.broadcast %11 : f32 to vector<8x128xf32>
    %13 = arith.mulf %7, %12 : vector<8x128xf32>
    %c1_7 = arith.constant 1 : index
    %c0_8 = arith.constant 0 : index
    %14 = memref.load %arg1[%c1_7, %c0_8] : memref<2x32xf32, #tpu.memory_space<smem>>
    %15 = vector.broadcast %14 : f32 to vector<8x128xf32>
    %16 = arith.mulf %8, %15 : vector<8x128xf32>
    %17 = arith.addf %13, %16 : vector<8x128xf32>
    %c0_9 = arith.constant 0 : index
    %18 = memref.load %arg2[%c0_9] : memref<32xf32, #tpu.memory_space<smem>>
    %19 = vector.broadcast %18 : f32 to vector<8x128xf32>
    %20 = arith.addf %17, %19 : vector<8x128xf32>
    %21 = math.tanh %20 : vector<8x128xf32>
    %c0_10 = arith.constant 0 : index
    %22 = memref.load %arg3[%c0_10] : memref<32xf32, #tpu.memory_space<smem>>
    %23 = vector.broadcast %22 : f32 to vector<8x128xf32>
    %24 = arith.mulf %21, %23 : vector<8x128xf32>
    %25 = arith.addf %10, %24 : vector<8x128xf32>
    %c0_11 = arith.constant 0 : index
    %c1_12 = arith.constant 1 : index
    %26 = memref.load %arg1[%c0_11, %c1_12] : memref<2x32xf32, #tpu.memory_space<smem>>
    %27 = vector.broadcast %26 : f32 to vector<8x128xf32>
    %28 = arith.mulf %7, %27 : vector<8x128xf32>
    %c1_13 = arith.constant 1 : index
    %c1_14 = arith.constant 1 : index
    %29 = memref.load %arg1[%c1_13, %c1_14] : memref<2x32xf32, #tpu.memory_space<smem>>
    %30 = vector.broadcast %29 : f32 to vector<8x128xf32>
    %31 = arith.mulf %8, %30 : vector<8x128xf32>
    %32 = arith.addf %28, %31 : vector<8x128xf32>
    %c1_15 = arith.constant 1 : index
    %33 = memref.load %arg2[%c1_15] : memref<32xf32, #tpu.memory_space<smem>>
    %34 = vector.broadcast %33 : f32 to vector<8x128xf32>
    %35 = arith.addf %32, %34 : vector<8x128xf32>
    %36 = math.tanh %35 : vector<8x128xf32>
    %c1_16 = arith.constant 1 : index
    %37 = memref.load %arg3[%c1_16] : memref<32xf32, #tpu.memory_space<smem>>
    %38 = vector.broadcast %37 : f32 to vector<8x128xf32>
    %39 = arith.mulf %36, %38 : vector<8x128xf32>
    %40 = arith.addf %25, %39 : vector<8x128xf32>
    %c0_17 = arith.constant 0 : index
    %c2 = arith.constant 2 : index
    %41 = memref.load %arg1[%c0_17, %c2] : memref<2x32xf32, #tpu.memory_space<smem>>
    %42 = vector.broadcast %41 : f32 to vector<8x128xf32>
    %43 = arith.mulf %7, %42 : vector<8x128xf32>
    %c1_18 = arith.constant 1 : index
    %c2_19 = arith.constant 2 : index
    %44 = memref.load %arg1[%c1_18, %c2_19] : memref<2x32xf32, #tpu.memory_space<smem>>
    %45 = vector.broadcast %44 : f32 to vector<8x128xf32>
    %46 = arith.mulf %8, %45 : vector<8x128xf32>
    %47 = arith.addf %43, %46 : vector<8x128xf32>
    %c2_20 = arith.constant 2 : index
    %48 = memref.load %arg2[%c2_20] : memref<32xf32, #tpu.memory_space<smem>>
    %49 = vector.broadcast %48 : f32 to vector<8x128xf32>
    %50 = arith.addf %47, %49 : vector<8x128xf32>
    %51 = math.tanh %50 : vector<8x128xf32>
    %c2_21 = arith.constant 2 : index
    %52 = memref.load %arg3[%c2_21] : memref<32xf32, #tpu.memory_space<smem>>
    %53 = vector.broadcast %52 : f32 to vector<8x128xf32>
    %54 = arith.mulf %51, %53 : vector<8x128xf32>
    %55 = arith.addf %40, %54 : vector<8x128xf32>
    %c0_22 = arith.constant 0 : index
    %c3 = arith.constant 3 : index
    %56 = memref.load %arg1[%c0_22, %c3] : memref<2x32xf32, #tpu.memory_space<smem>>
    %57 = vector.broadcast %56 : f32 to vector<8x128xf32>
    %58 = arith.mulf %7, %57 : vector<8x128xf32>
    %c1_23 = arith.constant 1 : index
    %c3_24 = arith.constant 3 : index
    %59 = memref.load %arg1[%c1_23, %c3_24] : memref<2x32xf32, #tpu.memory_space<smem>>
    %60 = vector.broadcast %59 : f32 to vector<8x128xf32>
    %61 = arith.mulf %8, %60 : vector<8x128xf32>
    %62 = arith.addf %58, %61 : vector<8x128xf32>
    %c3_25 = arith.constant 3 : index
    %63 = memref.load %arg2[%c3_25] : memref<32xf32, #tpu.memory_space<smem>>
    %64 = vector.broadcast %63 : f32 to vector<8x128xf32>
    %65 = arith.addf %62, %64 : vector<8x128xf32>
    %66 = math.tanh %65 : vector<8x128xf32>
    %c3_26 = arith.constant 3 : index
    %67 = memref.load %arg3[%c3_26] : memref<32xf32, #tpu.memory_space<smem>>
    %68 = vector.broadcast %67 : f32 to vector<8x128xf32>
    %69 = arith.mulf %66, %68 : vector<8x128xf32>
    %70 = arith.addf %55, %69 : vector<8x128xf32>
    %c0_27 = arith.constant 0 : index
    %c4 = arith.constant 4 : index
    %71 = memref.load %arg1[%c0_27, %c4] : memref<2x32xf32, #tpu.memory_space<smem>>
    %72 = vector.broadcast %71 : f32 to vector<8x128xf32>
    %73 = arith.mulf %7, %72 : vector<8x128xf32>
    %c1_28 = arith.constant 1 : index
    %c4_29 = arith.constant 4 : index
    %74 = memref.load %arg1[%c1_28, %c4_29] : memref<2x32xf32, #tpu.memory_space<smem>>
    %75 = vector.broadcast %74 : f32 to vector<8x128xf32>
    %76 = arith.mulf %8, %75 : vector<8x128xf32>
    %77 = arith.addf %73, %76 : vector<8x128xf32>
    %c4_30 = arith.constant 4 : index
    %78 = memref.load %arg2[%c4_30] : memref<32xf32, #tpu.memory_space<smem>>
    %79 = vector.broadcast %78 : f32 to vector<8x128xf32>
    %80 = arith.addf %77, %79 : vector<8x128xf32>
    %81 = math.tanh %80 : vector<8x128xf32>
    %c4_31 = arith.constant 4 : index
    %82 = memref.load %arg3[%c4_31] : memref<32xf32, #tpu.memory_space<smem>>
    %83 = vector.broadcast %82 : f32 to vector<8x128xf32>
    %84 = arith.mulf %81, %83 : vector<8x128xf32>
    %85 = arith.addf %70, %84 : vector<8x128xf32>
    %c0_32 = arith.constant 0 : index
    %c5 = arith.constant 5 : index
    %86 = memref.load %arg1[%c0_32, %c5] : memref<2x32xf32, #tpu.memory_space<smem>>
    %87 = vector.broadcast %86 : f32 to vector<8x128xf32>
    %88 = arith.mulf %7, %87 : vector<8x128xf32>
    %c1_33 = arith.constant 1 : index
    %c5_34 = arith.constant 5 : index
    %89 = memref.load %arg1[%c1_33, %c5_34] : memref<2x32xf32, #tpu.memory_space<smem>>
    %90 = vector.broadcast %89 : f32 to vector<8x128xf32>
    %91 = arith.mulf %8, %90 : vector<8x128xf32>
    %92 = arith.addf %88, %91 : vector<8x128xf32>
    %c5_35 = arith.constant 5 : index
    %93 = memref.load %arg2[%c5_35] : memref<32xf32, #tpu.memory_space<smem>>
    %94 = vector.broadcast %93 : f32 to vector<8x128xf32>
    %95 = arith.addf %92, %94 : vector<8x128xf32>
    %96 = math.tanh %95 : vector<8x128xf32>
    %c5_36 = arith.constant 5 : index
    %97 = memref.load %arg3[%c5_36] : memref<32xf32, #tpu.memory_space<smem>>
    %98 = vector.broadcast %97 : f32 to vector<8x128xf32>
    %99 = arith.mulf %96, %98 : vector<8x128xf32>
    %100 = arith.addf %85, %99 : vector<8x128xf32>
    %c0_37 = arith.constant 0 : index
    %c6 = arith.constant 6 : index
    %101 = memref.load %arg1[%c0_37, %c6] : memref<2x32xf32, #tpu.memory_space<smem>>
    %102 = vector.broadcast %101 : f32 to vector<8x128xf32>
    %103 = arith.mulf %7, %102 : vector<8x128xf32>
    %c1_38 = arith.constant 1 : index
    %c6_39 = arith.constant 6 : index
    %104 = memref.load %arg1[%c1_38, %c6_39] : memref<2x32xf32, #tpu.memory_space<smem>>
    %105 = vector.broadcast %104 : f32 to vector<8x128xf32>
    %106 = arith.mulf %8, %105 : vector<8x128xf32>
    %107 = arith.addf %103, %106 : vector<8x128xf32>
    %c6_40 = arith.constant 6 : index
    %108 = memref.load %arg2[%c6_40] : memref<32xf32, #tpu.memory_space<smem>>
    %109 = vector.broadcast %108 : f32 to vector<8x128xf32>
    %110 = arith.addf %107, %109 : vector<8x128xf32>
    %111 = math.tanh %110 : vector<8x128xf32>
    %c6_41 = arith.constant 6 : index
    %112 = memref.load %arg3[%c6_41] : memref<32xf32, #tpu.memory_space<smem>>
    %113 = vector.broadcast %112 : f32 to vector<8x128xf32>
    %114 = arith.mulf %111, %113 : vector<8x128xf32>
    %115 = arith.addf %100, %114 : vector<8x128xf32>
    %c0_42 = arith.constant 0 : index
    %c7 = arith.constant 7 : index
    %116 = memref.load %arg1[%c0_42, %c7] : memref<2x32xf32, #tpu.memory_space<smem>>
    %117 = vector.broadcast %116 : f32 to vector<8x128xf32>
    %118 = arith.mulf %7, %117 : vector<8x128xf32>
    %c1_43 = arith.constant 1 : index
    %c7_44 = arith.constant 7 : index
    %119 = memref.load %arg1[%c1_43, %c7_44] : memref<2x32xf32, #tpu.memory_space<smem>>
    %120 = vector.broadcast %119 : f32 to vector<8x128xf32>
    %121 = arith.mulf %8, %120 : vector<8x128xf32>
    %122 = arith.addf %118, %121 : vector<8x128xf32>
    %c7_45 = arith.constant 7 : index
    %123 = memref.load %arg2[%c7_45] : memref<32xf32, #tpu.memory_space<smem>>
    %124 = vector.broadcast %123 : f32 to vector<8x128xf32>
    %125 = arith.addf %122, %124 : vector<8x128xf32>
    %126 = math.tanh %125 : vector<8x128xf32>
    %c7_46 = arith.constant 7 : index
    %127 = memref.load %arg3[%c7_46] : memref<32xf32, #tpu.memory_space<smem>>
    %128 = vector.broadcast %127 : f32 to vector<8x128xf32>
    %129 = arith.mulf %126, %128 : vector<8x128xf32>
    %130 = arith.addf %115, %129 : vector<8x128xf32>
    %c0_47 = arith.constant 0 : index
    %c8 = arith.constant 8 : index
    %131 = memref.load %arg1[%c0_47, %c8] : memref<2x32xf32, #tpu.memory_space<smem>>
    %132 = vector.broadcast %131 : f32 to vector<8x128xf32>
    %133 = arith.mulf %7, %132 : vector<8x128xf32>
    %c1_48 = arith.constant 1 : index
    %c8_49 = arith.constant 8 : index
    %134 = memref.load %arg1[%c1_48, %c8_49] : memref<2x32xf32, #tpu.memory_space<smem>>
    %135 = vector.broadcast %134 : f32 to vector<8x128xf32>
    %136 = arith.mulf %8, %135 : vector<8x128xf32>
    %137 = arith.addf %133, %136 : vector<8x128xf32>
    %c8_50 = arith.constant 8 : index
    %138 = memref.load %arg2[%c8_50] : memref<32xf32, #tpu.memory_space<smem>>
    %139 = vector.broadcast %138 : f32 to vector<8x128xf32>
    %140 = arith.addf %137, %139 : vector<8x128xf32>
    %141 = math.tanh %140 : vector<8x128xf32>
    %c8_51 = arith.constant 8 : index
    %142 = memref.load %arg3[%c8_51] : memref<32xf32, #tpu.memory_space<smem>>
    %143 = vector.broadcast %142 : f32 to vector<8x128xf32>
    %144 = arith.mulf %141, %143 : vector<8x128xf32>
    %145 = arith.addf %130, %144 : vector<8x128xf32>
    %c0_52 = arith.constant 0 : index
    %c9 = arith.constant 9 : index
    %146 = memref.load %arg1[%c0_52, %c9] : memref<2x32xf32, #tpu.memory_space<smem>>
    %147 = vector.broadcast %146 : f32 to vector<8x128xf32>
    %148 = arith.mulf %7, %147 : vector<8x128xf32>
    %c1_53 = arith.constant 1 : index
    %c9_54 = arith.constant 9 : index
    %149 = memref.load %arg1[%c1_53, %c9_54] : memref<2x32xf32, #tpu.memory_space<smem>>
    %150 = vector.broadcast %149 : f32 to vector<8x128xf32>
    %151 = arith.mulf %8, %150 : vector<8x128xf32>
    %152 = arith.addf %148, %151 : vector<8x128xf32>
    %c9_55 = arith.constant 9 : index
    %153 = memref.load %arg2[%c9_55] : memref<32xf32, #tpu.memory_space<smem>>
    %154 = vector.broadcast %153 : f32 to vector<8x128xf32>
    %155 = arith.addf %152, %154 : vector<8x128xf32>
    %156 = math.tanh %155 : vector<8x128xf32>
    %c9_56 = arith.constant 9 : index
    %157 = memref.load %arg3[%c9_56] : memref<32xf32, #tpu.memory_space<smem>>
    %158 = vector.broadcast %157 : f32 to vector<8x128xf32>
    %159 = arith.mulf %156, %158 : vector<8x128xf32>
    %160 = arith.addf %145, %159 : vector<8x128xf32>
    %c0_57 = arith.constant 0 : index
    %c10 = arith.constant 10 : index
    %161 = memref.load %arg1[%c0_57, %c10] : memref<2x32xf32, #tpu.memory_space<smem>>
    %162 = vector.broadcast %161 : f32 to vector<8x128xf32>
    %163 = arith.mulf %7, %162 : vector<8x128xf32>
    %c1_58 = arith.constant 1 : index
    %c10_59 = arith.constant 10 : index
    %164 = memref.load %arg1[%c1_58, %c10_59] : memref<2x32xf32, #tpu.memory_space<smem>>
    %165 = vector.broadcast %164 : f32 to vector<8x128xf32>
    %166 = arith.mulf %8, %165 : vector<8x128xf32>
    %167 = arith.addf %163, %166 : vector<8x128xf32>
    %c10_60 = arith.constant 10 : index
    %168 = memref.load %arg2[%c10_60] : memref<32xf32, #tpu.memory_space<smem>>
    %169 = vector.broadcast %168 : f32 to vector<8x128xf32>
    %170 = arith.addf %167, %169 : vector<8x128xf32>
    %171 = math.tanh %170 : vector<8x128xf32>
    %c10_61 = arith.constant 10 : index
    %172 = memref.load %arg3[%c10_61] : memref<32xf32, #tpu.memory_space<smem>>
    %173 = vector.broadcast %172 : f32 to vector<8x128xf32>
    %174 = arith.mulf %171, %173 : vector<8x128xf32>
    %175 = arith.addf %160, %174 : vector<8x128xf32>
    %c0_62 = arith.constant 0 : index
    %c11 = arith.constant 11 : index
    %176 = memref.load %arg1[%c0_62, %c11] : memref<2x32xf32, #tpu.memory_space<smem>>
    %177 = vector.broadcast %176 : f32 to vector<8x128xf32>
    %178 = arith.mulf %7, %177 : vector<8x128xf32>
    %c1_63 = arith.constant 1 : index
    %c11_64 = arith.constant 11 : index
    %179 = memref.load %arg1[%c1_63, %c11_64] : memref<2x32xf32, #tpu.memory_space<smem>>
    %180 = vector.broadcast %179 : f32 to vector<8x128xf32>
    %181 = arith.mulf %8, %180 : vector<8x128xf32>
    %182 = arith.addf %178, %181 : vector<8x128xf32>
    %c11_65 = arith.constant 11 : index
    %183 = memref.load %arg2[%c11_65] : memref<32xf32, #tpu.memory_space<smem>>
    %184 = vector.broadcast %183 : f32 to vector<8x128xf32>
    %185 = arith.addf %182, %184 : vector<8x128xf32>
    %186 = math.tanh %185 : vector<8x128xf32>
    %c11_66 = arith.constant 11 : index
    %187 = memref.load %arg3[%c11_66] : memref<32xf32, #tpu.memory_space<smem>>
    %188 = vector.broadcast %187 : f32 to vector<8x128xf32>
    %189 = arith.mulf %186, %188 : vector<8x128xf32>
    %190 = arith.addf %175, %189 : vector<8x128xf32>
    %c0_67 = arith.constant 0 : index
    %c12 = arith.constant 12 : index
    %191 = memref.load %arg1[%c0_67, %c12] : memref<2x32xf32, #tpu.memory_space<smem>>
    %192 = vector.broadcast %191 : f32 to vector<8x128xf32>
    %193 = arith.mulf %7, %192 : vector<8x128xf32>
    %c1_68 = arith.constant 1 : index
    %c12_69 = arith.constant 12 : index
    %194 = memref.load %arg1[%c1_68, %c12_69] : memref<2x32xf32, #tpu.memory_space<smem>>
    %195 = vector.broadcast %194 : f32 to vector<8x128xf32>
    %196 = arith.mulf %8, %195 : vector<8x128xf32>
    %197 = arith.addf %193, %196 : vector<8x128xf32>
    %c12_70 = arith.constant 12 : index
    %198 = memref.load %arg2[%c12_70] : memref<32xf32, #tpu.memory_space<smem>>
    %199 = vector.broadcast %198 : f32 to vector<8x128xf32>
    %200 = arith.addf %197, %199 : vector<8x128xf32>
    %201 = math.tanh %200 : vector<8x128xf32>
    %c12_71 = arith.constant 12 : index
    %202 = memref.load %arg3[%c12_71] : memref<32xf32, #tpu.memory_space<smem>>
    %203 = vector.broadcast %202 : f32 to vector<8x128xf32>
    %204 = arith.mulf %201, %203 : vector<8x128xf32>
    %205 = arith.addf %190, %204 : vector<8x128xf32>
    %c0_72 = arith.constant 0 : index
    %c13 = arith.constant 13 : index
    %206 = memref.load %arg1[%c0_72, %c13] : memref<2x32xf32, #tpu.memory_space<smem>>
    %207 = vector.broadcast %206 : f32 to vector<8x128xf32>
    %208 = arith.mulf %7, %207 : vector<8x128xf32>
    %c1_73 = arith.constant 1 : index
    %c13_74 = arith.constant 13 : index
    %209 = memref.load %arg1[%c1_73, %c13_74] : memref<2x32xf32, #tpu.memory_space<smem>>
    %210 = vector.broadcast %209 : f32 to vector<8x128xf32>
    %211 = arith.mulf %8, %210 : vector<8x128xf32>
    %212 = arith.addf %208, %211 : vector<8x128xf32>
    %c13_75 = arith.constant 13 : index
    %213 = memref.load %arg2[%c13_75] : memref<32xf32, #tpu.memory_space<smem>>
    %214 = vector.broadcast %213 : f32 to vector<8x128xf32>
    %215 = arith.addf %212, %214 : vector<8x128xf32>
    %216 = math.tanh %215 : vector<8x128xf32>
    %c13_76 = arith.constant 13 : index
    %217 = memref.load %arg3[%c13_76] : memref<32xf32, #tpu.memory_space<smem>>
    %218 = vector.broadcast %217 : f32 to vector<8x128xf32>
    %219 = arith.mulf %216, %218 : vector<8x128xf32>
    %220 = arith.addf %205, %219 : vector<8x128xf32>
    %c0_77 = arith.constant 0 : index
    %c14 = arith.constant 14 : index
    %221 = memref.load %arg1[%c0_77, %c14] : memref<2x32xf32, #tpu.memory_space<smem>>
    %222 = vector.broadcast %221 : f32 to vector<8x128xf32>
    %223 = arith.mulf %7, %222 : vector<8x128xf32>
    %c1_78 = arith.constant 1 : index
    %c14_79 = arith.constant 14 : index
    %224 = memref.load %arg1[%c1_78, %c14_79] : memref<2x32xf32, #tpu.memory_space<smem>>
    %225 = vector.broadcast %224 : f32 to vector<8x128xf32>
    %226 = arith.mulf %8, %225 : vector<8x128xf32>
    %227 = arith.addf %223, %226 : vector<8x128xf32>
    %c14_80 = arith.constant 14 : index
    %228 = memref.load %arg2[%c14_80] : memref<32xf32, #tpu.memory_space<smem>>
    %229 = vector.broadcast %228 : f32 to vector<8x128xf32>
    %230 = arith.addf %227, %229 : vector<8x128xf32>
    %231 = math.tanh %230 : vector<8x128xf32>
    %c14_81 = arith.constant 14 : index
    %232 = memref.load %arg3[%c14_81] : memref<32xf32, #tpu.memory_space<smem>>
    %233 = vector.broadcast %232 : f32 to vector<8x128xf32>
    %234 = arith.mulf %231, %233 : vector<8x128xf32>
    %235 = arith.addf %220, %234 : vector<8x128xf32>
    %c0_82 = arith.constant 0 : index
    %c15 = arith.constant 15 : index
    %236 = memref.load %arg1[%c0_82, %c15] : memref<2x32xf32, #tpu.memory_space<smem>>
    %237 = vector.broadcast %236 : f32 to vector<8x128xf32>
    %238 = arith.mulf %7, %237 : vector<8x128xf32>
    %c1_83 = arith.constant 1 : index
    %c15_84 = arith.constant 15 : index
    %239 = memref.load %arg1[%c1_83, %c15_84] : memref<2x32xf32, #tpu.memory_space<smem>>
    %240 = vector.broadcast %239 : f32 to vector<8x128xf32>
    %241 = arith.mulf %8, %240 : vector<8x128xf32>
    %242 = arith.addf %238, %241 : vector<8x128xf32>
    %c15_85 = arith.constant 15 : index
    %243 = memref.load %arg2[%c15_85] : memref<32xf32, #tpu.memory_space<smem>>
    %244 = vector.broadcast %243 : f32 to vector<8x128xf32>
    %245 = arith.addf %242, %244 : vector<8x128xf32>
    %246 = math.tanh %245 : vector<8x128xf32>
    %c15_86 = arith.constant 15 : index
    %247 = memref.load %arg3[%c15_86] : memref<32xf32, #tpu.memory_space<smem>>
    %248 = vector.broadcast %247 : f32 to vector<8x128xf32>
    %249 = arith.mulf %246, %248 : vector<8x128xf32>
    %250 = arith.addf %235, %249 : vector<8x128xf32>
    %c0_87 = arith.constant 0 : index
    %c16 = arith.constant 16 : index
    %251 = memref.load %arg1[%c0_87, %c16] : memref<2x32xf32, #tpu.memory_space<smem>>
    %252 = vector.broadcast %251 : f32 to vector<8x128xf32>
    %253 = arith.mulf %7, %252 : vector<8x128xf32>
    %c1_88 = arith.constant 1 : index
    %c16_89 = arith.constant 16 : index
    %254 = memref.load %arg1[%c1_88, %c16_89] : memref<2x32xf32, #tpu.memory_space<smem>>
    %255 = vector.broadcast %254 : f32 to vector<8x128xf32>
    %256 = arith.mulf %8, %255 : vector<8x128xf32>
    %257 = arith.addf %253, %256 : vector<8x128xf32>
    %c16_90 = arith.constant 16 : index
    %258 = memref.load %arg2[%c16_90] : memref<32xf32, #tpu.memory_space<smem>>
    %259 = vector.broadcast %258 : f32 to vector<8x128xf32>
    %260 = arith.addf %257, %259 : vector<8x128xf32>
    %261 = math.tanh %260 : vector<8x128xf32>
    %c16_91 = arith.constant 16 : index
    %262 = memref.load %arg3[%c16_91] : memref<32xf32, #tpu.memory_space<smem>>
    %263 = vector.broadcast %262 : f32 to vector<8x128xf32>
    %264 = arith.mulf %261, %263 : vector<8x128xf32>
    %265 = arith.addf %250, %264 : vector<8x128xf32>
    %c0_92 = arith.constant 0 : index
    %c17 = arith.constant 17 : index
    %266 = memref.load %arg1[%c0_92, %c17] : memref<2x32xf32, #tpu.memory_space<smem>>
    %267 = vector.broadcast %266 : f32 to vector<8x128xf32>
    %268 = arith.mulf %7, %267 : vector<8x128xf32>
    %c1_93 = arith.constant 1 : index
    %c17_94 = arith.constant 17 : index
    %269 = memref.load %arg1[%c1_93, %c17_94] : memref<2x32xf32, #tpu.memory_space<smem>>
    %270 = vector.broadcast %269 : f32 to vector<8x128xf32>
    %271 = arith.mulf %8, %270 : vector<8x128xf32>
    %272 = arith.addf %268, %271 : vector<8x128xf32>
    %c17_95 = arith.constant 17 : index
    %273 = memref.load %arg2[%c17_95] : memref<32xf32, #tpu.memory_space<smem>>
    %274 = vector.broadcast %273 : f32 to vector<8x128xf32>
    %275 = arith.addf %272, %274 : vector<8x128xf32>
    %276 = math.tanh %275 : vector<8x128xf32>
    %c17_96 = arith.constant 17 : index
    %277 = memref.load %arg3[%c17_96] : memref<32xf32, #tpu.memory_space<smem>>
    %278 = vector.broadcast %277 : f32 to vector<8x128xf32>
    %279 = arith.mulf %276, %278 : vector<8x128xf32>
    %280 = arith.addf %265, %279 : vector<8x128xf32>
    %c0_97 = arith.constant 0 : index
    %c18 = arith.constant 18 : index
    %281 = memref.load %arg1[%c0_97, %c18] : memref<2x32xf32, #tpu.memory_space<smem>>
    %282 = vector.broadcast %281 : f32 to vector<8x128xf32>
    %283 = arith.mulf %7, %282 : vector<8x128xf32>
    %c1_98 = arith.constant 1 : index
    %c18_99 = arith.constant 18 : index
    %284 = memref.load %arg1[%c1_98, %c18_99] : memref<2x32xf32, #tpu.memory_space<smem>>
    %285 = vector.broadcast %284 : f32 to vector<8x128xf32>
    %286 = arith.mulf %8, %285 : vector<8x128xf32>
    %287 = arith.addf %283, %286 : vector<8x128xf32>
    %c18_100 = arith.constant 18 : index
    %288 = memref.load %arg2[%c18_100] : memref<32xf32, #tpu.memory_space<smem>>
    %289 = vector.broadcast %288 : f32 to vector<8x128xf32>
    %290 = arith.addf %287, %289 : vector<8x128xf32>
    %291 = math.tanh %290 : vector<8x128xf32>
    %c18_101 = arith.constant 18 : index
    %292 = memref.load %arg3[%c18_101] : memref<32xf32, #tpu.memory_space<smem>>
    %293 = vector.broadcast %292 : f32 to vector<8x128xf32>
    %294 = arith.mulf %291, %293 : vector<8x128xf32>
    %295 = arith.addf %280, %294 : vector<8x128xf32>
    %c0_102 = arith.constant 0 : index
    %c19 = arith.constant 19 : index
    %296 = memref.load %arg1[%c0_102, %c19] : memref<2x32xf32, #tpu.memory_space<smem>>
    %297 = vector.broadcast %296 : f32 to vector<8x128xf32>
    %298 = arith.mulf %7, %297 : vector<8x128xf32>
    %c1_103 = arith.constant 1 : index
    %c19_104 = arith.constant 19 : index
    %299 = memref.load %arg1[%c1_103, %c19_104] : memref<2x32xf32, #tpu.memory_space<smem>>
    %300 = vector.broadcast %299 : f32 to vector<8x128xf32>
    %301 = arith.mulf %8, %300 : vector<8x128xf32>
    %302 = arith.addf %298, %301 : vector<8x128xf32>
    %c19_105 = arith.constant 19 : index
    %303 = memref.load %arg2[%c19_105] : memref<32xf32, #tpu.memory_space<smem>>
    %304 = vector.broadcast %303 : f32 to vector<8x128xf32>
    %305 = arith.addf %302, %304 : vector<8x128xf32>
    %306 = math.tanh %305 : vector<8x128xf32>
    %c19_106 = arith.constant 19 : index
    %307 = memref.load %arg3[%c19_106] : memref<32xf32, #tpu.memory_space<smem>>
    %308 = vector.broadcast %307 : f32 to vector<8x128xf32>
    %309 = arith.mulf %306, %308 : vector<8x128xf32>
    %310 = arith.addf %295, %309 : vector<8x128xf32>
    %c0_107 = arith.constant 0 : index
    %c20 = arith.constant 20 : index
    %311 = memref.load %arg1[%c0_107, %c20] : memref<2x32xf32, #tpu.memory_space<smem>>
    %312 = vector.broadcast %311 : f32 to vector<8x128xf32>
    %313 = arith.mulf %7, %312 : vector<8x128xf32>
    %c1_108 = arith.constant 1 : index
    %c20_109 = arith.constant 20 : index
    %314 = memref.load %arg1[%c1_108, %c20_109] : memref<2x32xf32, #tpu.memory_space<smem>>
    %315 = vector.broadcast %314 : f32 to vector<8x128xf32>
    %316 = arith.mulf %8, %315 : vector<8x128xf32>
    %317 = arith.addf %313, %316 : vector<8x128xf32>
    %c20_110 = arith.constant 20 : index
    %318 = memref.load %arg2[%c20_110] : memref<32xf32, #tpu.memory_space<smem>>
    %319 = vector.broadcast %318 : f32 to vector<8x128xf32>
    %320 = arith.addf %317, %319 : vector<8x128xf32>
    %321 = math.tanh %320 : vector<8x128xf32>
    %c20_111 = arith.constant 20 : index
    %322 = memref.load %arg3[%c20_111] : memref<32xf32, #tpu.memory_space<smem>>
    %323 = vector.broadcast %322 : f32 to vector<8x128xf32>
    %324 = arith.mulf %321, %323 : vector<8x128xf32>
    %325 = arith.addf %310, %324 : vector<8x128xf32>
    %c0_112 = arith.constant 0 : index
    %c21 = arith.constant 21 : index
    %326 = memref.load %arg1[%c0_112, %c21] : memref<2x32xf32, #tpu.memory_space<smem>>
    %327 = vector.broadcast %326 : f32 to vector<8x128xf32>
    %328 = arith.mulf %7, %327 : vector<8x128xf32>
    %c1_113 = arith.constant 1 : index
    %c21_114 = arith.constant 21 : index
    %329 = memref.load %arg1[%c1_113, %c21_114] : memref<2x32xf32, #tpu.memory_space<smem>>
    %330 = vector.broadcast %329 : f32 to vector<8x128xf32>
    %331 = arith.mulf %8, %330 : vector<8x128xf32>
    %332 = arith.addf %328, %331 : vector<8x128xf32>
    %c21_115 = arith.constant 21 : index
    %333 = memref.load %arg2[%c21_115] : memref<32xf32, #tpu.memory_space<smem>>
    %334 = vector.broadcast %333 : f32 to vector<8x128xf32>
    %335 = arith.addf %332, %334 : vector<8x128xf32>
    %336 = math.tanh %335 : vector<8x128xf32>
    %c21_116 = arith.constant 21 : index
    %337 = memref.load %arg3[%c21_116] : memref<32xf32, #tpu.memory_space<smem>>
    %338 = vector.broadcast %337 : f32 to vector<8x128xf32>
    %339 = arith.mulf %336, %338 : vector<8x128xf32>
    %340 = arith.addf %325, %339 : vector<8x128xf32>
    %c0_117 = arith.constant 0 : index
    %c22 = arith.constant 22 : index
    %341 = memref.load %arg1[%c0_117, %c22] : memref<2x32xf32, #tpu.memory_space<smem>>
    %342 = vector.broadcast %341 : f32 to vector<8x128xf32>
    %343 = arith.mulf %7, %342 : vector<8x128xf32>
    %c1_118 = arith.constant 1 : index
    %c22_119 = arith.constant 22 : index
    %344 = memref.load %arg1[%c1_118, %c22_119] : memref<2x32xf32, #tpu.memory_space<smem>>
    %345 = vector.broadcast %344 : f32 to vector<8x128xf32>
    %346 = arith.mulf %8, %345 : vector<8x128xf32>
    %347 = arith.addf %343, %346 : vector<8x128xf32>
    %c22_120 = arith.constant 22 : index
    %348 = memref.load %arg2[%c22_120] : memref<32xf32, #tpu.memory_space<smem>>
    %349 = vector.broadcast %348 : f32 to vector<8x128xf32>
    %350 = arith.addf %347, %349 : vector<8x128xf32>
    %351 = math.tanh %350 : vector<8x128xf32>
    %c22_121 = arith.constant 22 : index
    %352 = memref.load %arg3[%c22_121] : memref<32xf32, #tpu.memory_space<smem>>
    %353 = vector.broadcast %352 : f32 to vector<8x128xf32>
    %354 = arith.mulf %351, %353 : vector<8x128xf32>
    %355 = arith.addf %340, %354 : vector<8x128xf32>
    %c0_122 = arith.constant 0 : index
    %c23 = arith.constant 23 : index
    %356 = memref.load %arg1[%c0_122, %c23] : memref<2x32xf32, #tpu.memory_space<smem>>
    %357 = vector.broadcast %356 : f32 to vector<8x128xf32>
    %358 = arith.mulf %7, %357 : vector<8x128xf32>
    %c1_123 = arith.constant 1 : index
    %c23_124 = arith.constant 23 : index
    %359 = memref.load %arg1[%c1_123, %c23_124] : memref<2x32xf32, #tpu.memory_space<smem>>
    %360 = vector.broadcast %359 : f32 to vector<8x128xf32>
    %361 = arith.mulf %8, %360 : vector<8x128xf32>
    %362 = arith.addf %358, %361 : vector<8x128xf32>
    %c23_125 = arith.constant 23 : index
    %363 = memref.load %arg2[%c23_125] : memref<32xf32, #tpu.memory_space<smem>>
    %364 = vector.broadcast %363 : f32 to vector<8x128xf32>
    %365 = arith.addf %362, %364 : vector<8x128xf32>
    %366 = math.tanh %365 : vector<8x128xf32>
    %c23_126 = arith.constant 23 : index
    %367 = memref.load %arg3[%c23_126] : memref<32xf32, #tpu.memory_space<smem>>
    %368 = vector.broadcast %367 : f32 to vector<8x128xf32>
    %369 = arith.mulf %366, %368 : vector<8x128xf32>
    %370 = arith.addf %355, %369 : vector<8x128xf32>
    %c0_127 = arith.constant 0 : index
    %c24 = arith.constant 24 : index
    %371 = memref.load %arg1[%c0_127, %c24] : memref<2x32xf32, #tpu.memory_space<smem>>
    %372 = vector.broadcast %371 : f32 to vector<8x128xf32>
    %373 = arith.mulf %7, %372 : vector<8x128xf32>
    %c1_128 = arith.constant 1 : index
    %c24_129 = arith.constant 24 : index
    %374 = memref.load %arg1[%c1_128, %c24_129] : memref<2x32xf32, #tpu.memory_space<smem>>
    %375 = vector.broadcast %374 : f32 to vector<8x128xf32>
    %376 = arith.mulf %8, %375 : vector<8x128xf32>
    %377 = arith.addf %373, %376 : vector<8x128xf32>
    %c24_130 = arith.constant 24 : index
    %378 = memref.load %arg2[%c24_130] : memref<32xf32, #tpu.memory_space<smem>>
    %379 = vector.broadcast %378 : f32 to vector<8x128xf32>
    %380 = arith.addf %377, %379 : vector<8x128xf32>
    %381 = math.tanh %380 : vector<8x128xf32>
    %c24_131 = arith.constant 24 : index
    %382 = memref.load %arg3[%c24_131] : memref<32xf32, #tpu.memory_space<smem>>
    %383 = vector.broadcast %382 : f32 to vector<8x128xf32>
    %384 = arith.mulf %381, %383 : vector<8x128xf32>
    %385 = arith.addf %370, %384 : vector<8x128xf32>
    %c0_132 = arith.constant 0 : index
    %c25 = arith.constant 25 : index
    %386 = memref.load %arg1[%c0_132, %c25] : memref<2x32xf32, #tpu.memory_space<smem>>
    %387 = vector.broadcast %386 : f32 to vector<8x128xf32>
    %388 = arith.mulf %7, %387 : vector<8x128xf32>
    %c1_133 = arith.constant 1 : index
    %c25_134 = arith.constant 25 : index
    %389 = memref.load %arg1[%c1_133, %c25_134] : memref<2x32xf32, #tpu.memory_space<smem>>
    %390 = vector.broadcast %389 : f32 to vector<8x128xf32>
    %391 = arith.mulf %8, %390 : vector<8x128xf32>
    %392 = arith.addf %388, %391 : vector<8x128xf32>
    %c25_135 = arith.constant 25 : index
    %393 = memref.load %arg2[%c25_135] : memref<32xf32, #tpu.memory_space<smem>>
    %394 = vector.broadcast %393 : f32 to vector<8x128xf32>
    %395 = arith.addf %392, %394 : vector<8x128xf32>
    %396 = math.tanh %395 : vector<8x128xf32>
    %c25_136 = arith.constant 25 : index
    %397 = memref.load %arg3[%c25_136] : memref<32xf32, #tpu.memory_space<smem>>
    %398 = vector.broadcast %397 : f32 to vector<8x128xf32>
    %399 = arith.mulf %396, %398 : vector<8x128xf32>
    %400 = arith.addf %385, %399 : vector<8x128xf32>
    %c0_137 = arith.constant 0 : index
    %c26 = arith.constant 26 : index
    %401 = memref.load %arg1[%c0_137, %c26] : memref<2x32xf32, #tpu.memory_space<smem>>
    %402 = vector.broadcast %401 : f32 to vector<8x128xf32>
    %403 = arith.mulf %7, %402 : vector<8x128xf32>
    %c1_138 = arith.constant 1 : index
    %c26_139 = arith.constant 26 : index
    %404 = memref.load %arg1[%c1_138, %c26_139] : memref<2x32xf32, #tpu.memory_space<smem>>
    %405 = vector.broadcast %404 : f32 to vector<8x128xf32>
    %406 = arith.mulf %8, %405 : vector<8x128xf32>
    %407 = arith.addf %403, %406 : vector<8x128xf32>
    %c26_140 = arith.constant 26 : index
    %408 = memref.load %arg2[%c26_140] : memref<32xf32, #tpu.memory_space<smem>>
    %409 = vector.broadcast %408 : f32 to vector<8x128xf32>
    %410 = arith.addf %407, %409 : vector<8x128xf32>
    %411 = math.tanh %410 : vector<8x128xf32>
    %c26_141 = arith.constant 26 : index
    %412 = memref.load %arg3[%c26_141] : memref<32xf32, #tpu.memory_space<smem>>
    %413 = vector.broadcast %412 : f32 to vector<8x128xf32>
    %414 = arith.mulf %411, %413 : vector<8x128xf32>
    %415 = arith.addf %400, %414 : vector<8x128xf32>
    %c0_142 = arith.constant 0 : index
    %c27 = arith.constant 27 : index
    %416 = memref.load %arg1[%c0_142, %c27] : memref<2x32xf32, #tpu.memory_space<smem>>
    %417 = vector.broadcast %416 : f32 to vector<8x128xf32>
    %418 = arith.mulf %7, %417 : vector<8x128xf32>
    %c1_143 = arith.constant 1 : index
    %c27_144 = arith.constant 27 : index
    %419 = memref.load %arg1[%c1_143, %c27_144] : memref<2x32xf32, #tpu.memory_space<smem>>
    %420 = vector.broadcast %419 : f32 to vector<8x128xf32>
    %421 = arith.mulf %8, %420 : vector<8x128xf32>
    %422 = arith.addf %418, %421 : vector<8x128xf32>
    %c27_145 = arith.constant 27 : index
    %423 = memref.load %arg2[%c27_145] : memref<32xf32, #tpu.memory_space<smem>>
    %424 = vector.broadcast %423 : f32 to vector<8x128xf32>
    %425 = arith.addf %422, %424 : vector<8x128xf32>
    %426 = math.tanh %425 : vector<8x128xf32>
    %c27_146 = arith.constant 27 : index
    %427 = memref.load %arg3[%c27_146] : memref<32xf32, #tpu.memory_space<smem>>
    %428 = vector.broadcast %427 : f32 to vector<8x128xf32>
    %429 = arith.mulf %426, %428 : vector<8x128xf32>
    %430 = arith.addf %415, %429 : vector<8x128xf32>
    %c0_147 = arith.constant 0 : index
    %c28 = arith.constant 28 : index
    %431 = memref.load %arg1[%c0_147, %c28] : memref<2x32xf32, #tpu.memory_space<smem>>
    %432 = vector.broadcast %431 : f32 to vector<8x128xf32>
    %433 = arith.mulf %7, %432 : vector<8x128xf32>
    %c1_148 = arith.constant 1 : index
    %c28_149 = arith.constant 28 : index
    %434 = memref.load %arg1[%c1_148, %c28_149] : memref<2x32xf32, #tpu.memory_space<smem>>
    %435 = vector.broadcast %434 : f32 to vector<8x128xf32>
    %436 = arith.mulf %8, %435 : vector<8x128xf32>
    %437 = arith.addf %433, %436 : vector<8x128xf32>
    %c28_150 = arith.constant 28 : index
    %438 = memref.load %arg2[%c28_150] : memref<32xf32, #tpu.memory_space<smem>>
    %439 = vector.broadcast %438 : f32 to vector<8x128xf32>
    %440 = arith.addf %437, %439 : vector<8x128xf32>
    %441 = math.tanh %440 : vector<8x128xf32>
    %c28_151 = arith.constant 28 : index
    %442 = memref.load %arg3[%c28_151] : memref<32xf32, #tpu.memory_space<smem>>
    %443 = vector.broadcast %442 : f32 to vector<8x128xf32>
    %444 = arith.mulf %441, %443 : vector<8x128xf32>
    %445 = arith.addf %430, %444 : vector<8x128xf32>
    %c0_152 = arith.constant 0 : index
    %c29 = arith.constant 29 : index
    %446 = memref.load %arg1[%c0_152, %c29] : memref<2x32xf32, #tpu.memory_space<smem>>
    %447 = vector.broadcast %446 : f32 to vector<8x128xf32>
    %448 = arith.mulf %7, %447 : vector<8x128xf32>
    %c1_153 = arith.constant 1 : index
    %c29_154 = arith.constant 29 : index
    %449 = memref.load %arg1[%c1_153, %c29_154] : memref<2x32xf32, #tpu.memory_space<smem>>
    %450 = vector.broadcast %449 : f32 to vector<8x128xf32>
    %451 = arith.mulf %8, %450 : vector<8x128xf32>
    %452 = arith.addf %448, %451 : vector<8x128xf32>
    %c29_155 = arith.constant 29 : index
    %453 = memref.load %arg2[%c29_155] : memref<32xf32, #tpu.memory_space<smem>>
    %454 = vector.broadcast %453 : f32 to vector<8x128xf32>
    %455 = arith.addf %452, %454 : vector<8x128xf32>
    %456 = math.tanh %455 : vector<8x128xf32>
    %c29_156 = arith.constant 29 : index
    %457 = memref.load %arg3[%c29_156] : memref<32xf32, #tpu.memory_space<smem>>
    %458 = vector.broadcast %457 : f32 to vector<8x128xf32>
    %459 = arith.mulf %456, %458 : vector<8x128xf32>
    %460 = arith.addf %445, %459 : vector<8x128xf32>
    %c0_157 = arith.constant 0 : index
    %c30 = arith.constant 30 : index
    %461 = memref.load %arg1[%c0_157, %c30] : memref<2x32xf32, #tpu.memory_space<smem>>
    %462 = vector.broadcast %461 : f32 to vector<8x128xf32>
    %463 = arith.mulf %7, %462 : vector<8x128xf32>
    %c1_158 = arith.constant 1 : index
    %c30_159 = arith.constant 30 : index
    %464 = memref.load %arg1[%c1_158, %c30_159] : memref<2x32xf32, #tpu.memory_space<smem>>
    %465 = vector.broadcast %464 : f32 to vector<8x128xf32>
    %466 = arith.mulf %8, %465 : vector<8x128xf32>
    %467 = arith.addf %463, %466 : vector<8x128xf32>
    %c30_160 = arith.constant 30 : index
    %468 = memref.load %arg2[%c30_160] : memref<32xf32, #tpu.memory_space<smem>>
    %469 = vector.broadcast %468 : f32 to vector<8x128xf32>
    %470 = arith.addf %467, %469 : vector<8x128xf32>
    %471 = math.tanh %470 : vector<8x128xf32>
    %c30_161 = arith.constant 30 : index
    %472 = memref.load %arg3[%c30_161] : memref<32xf32, #tpu.memory_space<smem>>
    %473 = vector.broadcast %472 : f32 to vector<8x128xf32>
    %474 = arith.mulf %471, %473 : vector<8x128xf32>
    %475 = arith.addf %460, %474 : vector<8x128xf32>
    %c0_162 = arith.constant 0 : index
    %c31 = arith.constant 31 : index
    %476 = memref.load %arg1[%c0_162, %c31] : memref<2x32xf32, #tpu.memory_space<smem>>
    %477 = vector.broadcast %476 : f32 to vector<8x128xf32>
    %478 = arith.mulf %7, %477 : vector<8x128xf32>
    %c1_163 = arith.constant 1 : index
    %c31_164 = arith.constant 31 : index
    %479 = memref.load %arg1[%c1_163, %c31_164] : memref<2x32xf32, #tpu.memory_space<smem>>
    %480 = vector.broadcast %479 : f32 to vector<8x128xf32>
    %481 = arith.mulf %8, %480 : vector<8x128xf32>
    %482 = arith.addf %478, %481 : vector<8x128xf32>
    %c31_165 = arith.constant 31 : index
    %483 = memref.load %arg2[%c31_165] : memref<32xf32, #tpu.memory_space<smem>>
    %484 = vector.broadcast %483 : f32 to vector<8x128xf32>
    %485 = arith.addf %482, %484 : vector<8x128xf32>
    %486 = math.tanh %485 : vector<8x128xf32>
    %c31_166 = arith.constant 31 : index
    %487 = memref.load %arg3[%c31_166] : memref<32xf32, #tpu.memory_space<smem>>
    %488 = vector.broadcast %487 : f32 to vector<8x128xf32>
    %489 = arith.mulf %486, %488 : vector<8x128xf32>
    %490 = arith.addf %475, %489 : vector<8x128xf32>
    %cst = arith.constant 5.000000e-01 : f32
    %491 = vector.broadcast %cst : f32 to vector<8x128xf32>
    %492 = arith.mulf %491, %490 : vector<8x128xf32>
    %493 = math.tanh %492 : vector<8x128xf32>
    %cst_167 = arith.constant 1.000000e+00 : f32
    %494 = vector.broadcast %cst_167 : f32 to vector<8x128xf32>
    %495 = arith.addf %493, %494 : vector<8x128xf32>
    %cst_168 = arith.constant 5.000000e-01 : f32
    %496 = vector.broadcast %cst_168 : f32 to vector<8x128xf32>
    %497 = arith.mulf %496, %495 : vector<8x128xf32>
    %c0_169 = arith.constant 0 : index
    %c0_170 = arith.constant 0 : index
    %498 = vector.load %arg6[%c0_169, %c0_170] : memref<8x128xf32, #tpu.memory_space<vmem>>, vector<8x128xf32>
    tpu.vector_store %arg6[%c0_169, %c0_170], %497 {strides = array<i32>} : memref<8x128xf32, #tpu.memory_space<vmem>>, vector<8x128xf32>,
    return
  }
  func.func @transform_0(%arg0: i32) -> (i32, i32) {
    %c0_i32 = arith.constant 0 : i32
    %c0_i32_0 = arith.constant 0 : i32
    %c0_i32_1 = arith.constant 0 : i32
    return %c0_i32, %c0_i32_0 : i32, i32
  }
  func.func @transform_1(%arg0: i32) -> i32 {
    %c0_i32 = arith.constant 0 : i32
    %c0_i32_0 = arith.constant 0 : i32
    return %c0_i32 : i32
  }
  func.func @transform_2(%arg0: i32) -> i32 {
    %c0_i32 = arith.constant 0 : i32
    %c0_i32_0 = arith.constant 0 : i32
    return %c0_i32 : i32
  }
  func.func @transform_3(%arg0: i32) -> i32 {
    %c0_i32 = arith.constant 0 : i32
    %c0_i32_0 = arith.constant 0 : i32
    return %c0_i32 : i32
  }
  func.func @transform_4(%arg0: i32) -> (i32, i32, i32) {
    %c0_i32 = arith.constant 0 : i32
    %c0_i32_0 = arith.constant 0 : i32
    %c0_i32_1 = arith.constant 0 : i32
    return %c0_i32, %arg0, %c0_i32_0 : i32, i32, i32
  }
  func.func @transform_5(%arg0: i32) -> (i32, i32) {
    %c0_i32 = arith.constant 0 : i32
    %c0_i32_0 = arith.constant 0 : i32
    return %arg0, %c0_i32 : i32, i32
  }
}

</mosaic_0001>

<bundles_post_ra>
// kernel: tpu_custom_call.1
= control target key start
LH: loop header
LB: loop body
LE: loop exit
PB: predicated region body
PF: predicated region fallthrough
CT: control target
= control target key end

     0   :  { %s2400_s0 = inlined_call_operand.vmem [shape: f32[2,32], index: 0, kind: input, shape index: {}]   ;;  %s2401_s1 = inlined_call_operand.vmem [shape: f32[32], index: 1, kind: input, shape index: {}]   ;;  %s2402_s2 = inlined_call_operand.vmem [shape: f32[32], index: 2, kind: input, shape index: {}]   ;;  %s2403_s3 = inlined_call_operand.<no memory space> [shape: f32[1], index: 3, kind: input, shape index: {}]   ;;  %s2404_s4 = inlined_call_operand.hbm [shape: f32[2,24,128], index: 4, kind: input, shape index: {}]   ;;  %s2405_s5 = inlined_call_operand.hbm [shape: f32[24,128], index: 5, kind: output, shape index: {}]  }
   0x1   :  { %2465 = sst [smem:[#allocation65_spill]] %s2400_s0 }
   0x2   :  { %2466 = sst [smem:[#allocation66_spill]] %s2401_s1 }
   0x3   :  { %2467 = sst [smem:[#allocation67_spill]] %s2402_s2 }
   0x4   :  { %2468 = sst [smem:[#allocation68_spill]] %s2404_s4 }
   0x5   :  { %2469 = sst [smem:[#allocation69_spill]] %s2405_s5 }
   0x6   :  { %10 = sst [smem:[#allocation2]] %s2403_s3 }
   0x7   :  { %11 = vsyncpa [#allocation6], 0 }
   0x8   :  { %12 = vsyncpa [#allocation8], 0 }
   0x9   :  { %13 = vsyncpa [#allocation4], 0 }
   0xa   :  { %15 = vsyncpa [#allocation4 + $0x1], 0 }
   0xb   :  { %16 = vsyncpa [#allocation5], 0 }
   0xc   :  { %18 = vsyncpa [#allocation5 + $0x1], 0  ;;  %s1434_s20 = smov 0   ;;  %s1436_s21 = smov 0  }
   0xd   :  { %s1438_s22 = smov 0   ;;  %s1440_s23 = smov 0  }
   0xe LB: > { %2470 = sst [smem:[#allocation16_spill]] %s1377_s20  ;;  %s1455_s3 = sadd.s32 4294967295, %s1389_s23   ;;  %s1389_s23 = sphi %s1440_s23, %s2610_s23   ;;  %s1385_s22 = sphi %s1438_s22, %s2613_s22   ;;  %s1381_s21 = sphi %s1436_s21, %s2612_s21   ;;  %s1377_s20 = sphi %s1434_s20, %s2611_s20  }
   0xf   : > { %2471 = sst [smem:[#allocation17_spill]] %s1381_s21  ;;  %s944_s24 = sadd.s32 4294967294, %s1389_s23  }
  0x10   : > { %2472 = sst [smem:[#allocation18_spill]] %s1385_s22  ;;  %s1459_s25 = sadd.s32 1, %s1389_s23  }
  0x11   : > { %2473 = sst [smem:[#allocation19_spill]] %s1389_s23  ;;  %s115_s26 = sadd.s32 1, %s1385_s22 }
  0x12   : > { %2474 = sst [smem:[#allocation20_spill]] %s1455_s3  ;;  %s112_s27 = ssub.s32 %s1389_s23, %s1459_s25 }
  0x13   : > { %2475 = sst [smem:[#allocation21_spill]] %s1459_s25  ;;  %p122_p0 = scmp.ne.s32.totalorder %s1385_s22, %s1381_s21 }
  0x14   : > { %p113_p1 = scmp.eq.s32.totalorder %s112_s27, 0  ;;  %p123_p2 = scmp.eq.s32.totalorder %s1389_s23, 0 }
  0x15   : > { %p128_p3 = scmp.ne.s32.totalorder %s1381_s21, %s1377_s20  ;;  %p2406_p4 = scmp.eq.s32.totalorder %s1455_s3, 0 }
  0x16   : > { %s1471_s28 = scalar_select %p113_p1, %s1385_s22, %s115_s26  }
  0x17   : > { %p1473_p5 = por %p123_p2, %p122_p0  ;;  %p1479_p6 = por %p2406_p4, %p128_p3 }
  0x18   : > { %2476 = sst [smem:[#allocation22_spill]] %s1471_s28  ;;  %p152_p7 = scmp.eq.s32.totalorder %s1455_s3, 2 }
  0x19   : > { %s2478_s30 = scalar_select %p1479_p6, 1, 0 }
  0x1a   : > { %p158_p8 = scmp.eq.s32.totalorder %s944_s24, 2  ;;  %p945_p9 = scmp.ge.s32.totalorder %s1389_s23, 1 }
  0x1b   : > { %p165_p10 = scmp.lt.s32.totalorder %s1389_s23, 4  ;;  %p1486_p11 = por %p152_p7, %p122_p0 }
  0x1c   : > { %p1490_p12 = por %p158_p8, %p128_p3  ;;  %s2484_s1 = sld [smem:[#allocation66_spill]] }
  0x1d   : > { %s2479_s6 = scalar_select %p1486_p11, 1, 0 }
  0x1e   : > { %s2481_s7 = scalar_select %p1490_p12, 1, 0 }
  0x1f   : > { %2480 = sst [smem:[#allocation23_spill]] %s2479_s6  ;;  %p1494_p13 = pnand %p945_p9, %p165_p10 }
  0x20   : > { %2482 = sst [smem:[#allocation24_spill]] %s2481_s7  ;;  %p1125_p0 = scmp.lt.s32.totalorder %s1389_s23, 3 }
  0x21   : > { %s2483_s8 = scalar_select %p1494_p13, 1, 0 }
  0x22   : > { %s189_s11 = sshll.u32 %s2484_s1, 4  ;;  %p1104_p1 = pneg %p1494_p13  ;;  %s190_s11 = int_to_ptr.vmem [resolvable:$true] %s189_s11 }
  0x23   : > { %s2486_s0 = sld [smem:[#allocation65_spill]]  ;;  %p1515_p3 = pnand %p1125_p0, %p1473_p5 }
  0x24   : > { %p1506_p2 = pnand %p1104_p1, %p2406_p4  ;;  %s1240_s17 = scalar_lea.vmem %s190_s11, 16 }
  0x25   : > { %s2487_s16 = scalar_select %p1515_p3, 1, 0 }
  0x26   : > { %p1241_p7 = scmp.ne.s32.totalorder %s190_s11, %s1240_s17  ;;  %p1242_p8 = pneg %p1506_p2 }
  0x27   : > { %p1248_p1 = scmp.lt.s32.totalorder %s190_s11, %s190_s11  ;;  %p1249_p4 = scmp.lt.s32.totalorder %s1240_s17, %s1240_s17 }
  0x28   : > { %p1243_p9 = pnand %p1242_p8, %p1241_p7 }
  0x29   : > { %s178_s15 = sshll.u32 %s2486_s0, 4  ;;  %p1250_p12 = por %p1249_p4, %p1248_p1  ;;  %s179_s15 = int_to_ptr.vmem [resolvable:$true] %s178_s15 }
  0x2a   : > { %p1244_p10 = pneg %p1243_p9 }
  0x2c   : > { %p1251_p11 = pnand %p1250_p12, %p1244_p10 }
  0x2e   : > { %1254 = shalt.err (!%p1251_p11)
}
  0x2f   : > { %s1391_s18 = smov [#allocation7]   ;;  %s2488_s2 = sld [smem:[#allocation67_spill]] }
  0x30   : > { %1110 = dma.vmem_to_smem (!%p1506_p2), %s190_s11, 16, %s1391_s18, [#allocation8]  }
  0x31   : > { %s1255_s27 = scalar_lea.vmem %s179_s15, 32  ;;  %p1263_p9 = scmp.lt.s32.totalorder %s179_s15, %s179_s15 }
  0x32   : > { %p1256_p5 = scmp.ne.s32.totalorder %s179_s15, %s1255_s27  ;;  %p1264_p6 = scmp.lt.s32.totalorder %s1255_s27, %s1255_s27 }
  0x34   : > { %p1258_p0 = pnand %p1256_p5, %p1242_p8  ;;  %p1265_p4 = por %p1264_p6, %p1263_p9 }
  0x35   : > { %s200_s26 = sshll.u32 %s2488_s2, 4  ;;  %s201_s26 = int_to_ptr.vmem [resolvable:$true] %s200_s26 }
  0x36   : > { %p1259_p7 = pneg %p1258_p0 }
  0x38   : > { %p1266_p12 = pnand %p1265_p4, %p1259_p7 }
  0x3a   : > { %1269 = shalt.err (!%p1266_p12)
}
  0x3b   : > { %s1392_s29 = smov [#allocation3]   ;;  %s1270_s9 = scalar_lea.vmem %s201_s26, 16 }
  0x3c   : > { %1107 = dma.vmem_to_smem (!%p1506_p2), %s179_s15, 32, %s1392_s29, [#allocation6]  }
  0x3d   : > { %p1271_p11 = scmp.ne.s32.totalorder %s201_s26, %s1270_s9  ;;  %p1278_p13 = scmp.lt.s32.totalorder %s201_s26, %s201_s26 }
  0x3e   : > { %p1279_p5 = scmp.lt.s32.totalorder %s1270_s9, %s1270_s9 }
  0x3f   : > { %p1273_p10 = pnand %p1271_p11, %p1242_p8 }
  0x40   : > { %p1280_p0 = por %p1279_p5, %p1278_p13 }
  0x41   : > { %p1274_p1 = pneg %p1273_p10 }
  0x43   : > { %p1281_p3 = pnand %p1280_p0, %p1274_p1 }
  0x45   : > { %1284 = shalt.err (!%p1281_p3)
}
  0x46   : > { %s1393_s10 = smov [#allocation9]   ;;  %s214_s11 = sand.u32 1, %s1385_s22  }
  0x47   : > { %1113 = dma.vmem_to_smem (!%p1506_p2), %s201_s26, 16, %s1393_s10, [#allocation8]  }
  0x48   : > { %s951_s13 = sshll.u32 %s1389_s23, 7  ;;  %s950_s14 = sshll.u32 %s214_s11, 4 }
  0x49   : > { %s2489_s4 = sld [smem:[#allocation68_spill]]  ;;  %s218_s19 = scalar_lea.vmem [#allocation10], %s950_s14 }
  0x4a   : > { %s224_s24 = sshll.u32 %s218_s19, 4  ;;  %s1548_s12 = scalar_lea.sflag [#allocation4], %s214_s11  ;;  %s1546_s24 = int_to_ptr.vmem [resolvable:$true] %s224_s24 }
  0x4b   : > { %p2490_p13 = scmp.ne.s32.totalorder %s2487_s16, 0 }
  0x4d   : > { %p1287_p2 = pneg %p2490_p13 }
  0x4f   : > { %s1544_s18 = scalar_lea.hbm %s2489_s4, %s951_s13  ;;  %s1290_s9 = scalar_lea.hbm %s2489_s4, 768 }
  0x50   : > { %s1285_s27 = scalar_lea.hbm %s1544_s18, 256  ;;  %p1291_p7 = scmp.lt.u32.totalorder %s1544_s18, %s2489_s4 }
  0x51   : > { %p1286_p6 = scmp.ne.s32.totalorder %s1544_s18, %s1285_s27  ;;  %p1292_p9 = scmp.lt.u32.totalorder %s1290_s9, %s1285_s27 }
  0x52   : > { %p1294_p12 = scmp.lt.u32.totalorder %s1285_s27, %s1544_s18 }
  0x53   : > { %p1288_p3 = pnand %p1287_p2, %p1286_p6  ;;  %p1293_p4 = por %p1292_p9, %p1291_p7 }
  0x55   : > { %p1289_p8 = pneg %p1288_p3  ;;  %p1295_p11 = por %p1294_p12, %p1293_p4 }
  0x57   : > { %p1296_p10 = pnand %p1295_p11, %p1289_p8 }
  0x59   : > { %1299 = shalt.err (!%p1296_p10)
}
  0x5a   : > { %s1300_s11 = scalar_lea.vmem %s1546_s24, 256  ;;  %s1394_s14 = smov [#allocation10]  }
  0x5b   : > { %p1301_p1 = scmp.ne.s32.totalorder %s1546_s24, %s1300_s11  ;;  %s1305_s15 = sshll.u32 %s1394_s14, 4  ;;  %s1306_s15 = int_to_ptr.vmem [resolvable:$false] %s1305_s15 }
  0x5c   : > { %s1307_s17 = scalar_lea.vmem %s1306_s15, 512  ;;  %p1308_p6 = scmp.lt.s32.totalorder %s1546_s24, %s1306_s15 }
  0x5d   : > { %p1303_p5 = pnand %p1301_p1, %p1287_p2  ;;  %p1309_p3 = scmp.lt.s32.totalorder %s1307_s17, %s1300_s11 }
  0x5f   : > { %p1304_p0 = pneg %p1303_p5  ;;  %p1310_p7 = por %p1309_p3, %p1308_p6 }
  0x61   : > { %p1311_p9 = pnand %p1310_p7, %p1304_p0 }
  0x63   : > { %1314 = shalt.err (!%p1311_p9)
}
  0x64   : > { %s1395_s19 = smov 384   ;;  %s1396_s27 = smov 128  }
  0x65   : > { %s1397_s26 = smov 8   ;;  %p2491_p2 = scmp.ne.s32.totalorder %s2483_s8, 0 }
  0x66   : > { %1117 = dma.hbm_to_vmem [thread:$0]  (!%p2490_p13), %s1544_s18, 256, %s1546_s24, %s1548_s12, %s1395_s19, %s1396_s27, %s1397_s26  }
  0x67   : > { %236 = sbr.rel (%p2491_p2) target bundleno = 307 (0x133), region = 40 }
  0x6e   : > { %p2492_p8 = scmp.eq.s32.totalorder %s1455_s3, 0 }
  0x70   : > { %1360 = dma.done.wait (%p2492_p8), [#allocation6], 32   ;;  %p2493_p4 = pmov %p2492_p8 }
  0x72   : > { %1362 = vsyncadd (%p2493_p4), [#allocation6], 4294967264  ;;  %p2494_p12 = pmov %p2493_p4 }
  0x73   : > { %p2495_p11 = pmov %p2493_p4 }
  0x74   : > { %1364 = dma.done.wait (%p2494_p12), [#allocation8], 32  }
  0x75   : > { %1366 = vsyncadd (%p2495_p11), [#allocation8], 4294967264  ;;  %s1587_s29 = sand.u32 1, %s1381_s21   ;;  %p2497_p13 = scmp.ne.s32.totalorder %s2478_s30, 0 }
  0x76   : > { %2496 = sst [smem:[#allocation25_spill]] %s1587_s29  ;;  %s956_s8 = sshll.u32 %s1587_s29, 4 }
  0x77   : > { %s251_s16 = scalar_lea.sflag [#allocation4], %s1587_s29  ;;  %s254_s18 = scalar_lea.vmem [#allocation10], %s956_s8 }
  0x78   : > { %1368 = dma.done.wait (%p2497_p13), %s251_s16, 256  }
  0x79   : > { %1370 = vsyncadd (%p2497_p13), %s251_s16, 4294967040 }
  0x7a   : > { %259 = sfence }
  0x7b   : > { %v1595_v0 = vld [vmem:[%s254_s18] sm:$0xff]  ;;  %v1597_v1 = vld [vmem:[%s254_s18 + $0x8] sm:$0xff]  ;;  %s1624_s30 = sld [smem:[#allocation2]]  ;;  %s1626_s24 = sld [smem:[#allocation3]]  ;;  %v1398_v21 = vmov 0.0  }
  0x7c   : > { %v1600_v2 = vand.u32 2147483647, %v1595_v0  ;;  %v1603_v3 = vand.u32 2147483647, %v1597_v1  ;;  %v285_v7 = vmul.f32 %v1595_v0, %v1595_v0  ;;  %v286_v8 = vmul.f32 %v1597_v1, %v1597_v1  ;;  %s1628_s12 = sld [smem:[#allocation3 + $0x80]]  ;;  %s1634_s13 = sld [smem:[#allocation3 + $0x1]] }
  0x7d   : > { %s1630_s9 = sld [smem:[#allocation7]]  ;;  %s1636_s11 = sld [smem:[#allocation3 + $0x81]]  ;;  %vm325_vm0 = vcmp.lt.s32.totalorder %v1595_v0, 0  ;;  %vm322_vm1 = vcmp.lt.f32.partialorder %v1595_v0, 0.0  ;;  %v1399_v24 = vmov 0.7853982   ;;  %vm329_vm5 = vcmp.ne.f32.partialorder %v1595_v0, %v1595_v0 }
  0x7e   : > { %v298_v4 = vmax.f32 %v1600_v2, %v1603_v3  ;;  %v297_v5 = vmin.f32 %v1600_v2, %v1603_v3  ;;  %v1619_v11 = vadd.f32 %v286_v8, %v285_v7  ;;  %s1632_s10 = sld [smem:[#allocation9]]  ;;  %s1638_s14 = sld [smem:[#allocation7 + $0x1]]  ;;  %v1672_v22 = vsel %vm325_vm0, 3.1415927, %v1398_v21 }
  0x7f   : > { %s1641_s15 = sld [smem:[#allocation9 + $0x1]]  ;;  %s1643_s17 = sld [smem:[#allocation3 + $0x2]]  ;;  %v1681_v25 = vsel %vm322_vm1, 2.3561945, %v1399_v24  ;;  %v340_v30 = vand.u32 2147483648, %v1597_v1  ;;  %vm319_vm4 = vcmp.gt.f32.partialorder %v1603_v3, %v1600_v2  ;;  %vm330_vm6 = vcmp.ne.f32.partialorder %v1597_v1, %v1597_v1 }
  0x80   : > { %1170 = vrcp.f32 %v298_v4  ;;  %s1645_s19 = sld [smem:[#allocation3 + $0x82]]  ;;  %s1651_s8 = sld [smem:[#allocation3 + $0x3]]  ;;  %vm290_vm2 = vcmp.eq.f32.partialorder %v1619_v11, inf  ;;  %vm292_vm3 = vcmp.eq.f32.partialorder %v1619_v11, 0.0  ;;  %v293_v28 = vand.u32 2147483648, %v1619_v11  ;;  %vm1883_vm10 = vmor %vm329_vm5, %vm330_vm6 }
  0x81   : > { %1172 = vrsqrt.f32 %v1619_v11  ;;  %2498 = sst [smem:[#allocation26_spill]] %s1624_s30  ;;  %s1653_s16 = sld [smem:[#allocation3 + $0x83]]  ;;  %v343_v32 = vstv %s1624_s30  ;;  %v345_v33 = vstv %s1626_s24  ;;  %vm335_vm7 = vcmp.eq.s32.totalorder %v1600_v2, inf }
  0x82   : > { %2499 = sst [smem:[#allocation27_spill]] %s1628_s12  ;;  %s1647_s27 = sld [smem:[#allocation7 + $0x2]]  ;;  %v348_v34 = vstv %s1628_s12  ;;  %v360_v38 = vstv %s1634_s13  ;;  %vm336_vm8 = vcmp.eq.s32.totalorder %v1603_v3, inf  ;;  %vm327_vm9 = vcmp.eq.f32.partialorder %v1597_v1, 0.0 }
  0x83   : > { %2500 = sst [smem:[#allocation28_spill]] %s1630_s9  ;;  %s1649_s26 = sld [smem:[#allocation9 + $0x2]]  ;;  %v352_v36 = vstv %s1630_s9  ;;  %v363_v39 = vstv %s1636_s11  ;;  %vm337_vm11 = vmand %vm335_vm7, %vm336_vm8 }
  0x84   : > { %2501 = sst [smem:[#allocation29_spill]] %s1632_s10  ;;  %s1655_s18 = sld [smem:[#allocation7 + $0x3]]  ;;  %v356_v37 = vstv %s1632_s10  ;;  %v367_v40 = vstv %s1638_s14 }
  0x85   : > { %2502 = sst [smem:[#allocation30_spill]] %s1636_s11  ;;  %s1659_s0 = sld [smem:[#allocation9 + $0x3]]  ;;  %v371_v41 = vstv %s1641_s15  ;;  %v375_v42 = vstv %s1643_s17 }
  0x86   : > { %2503 = sst [smem:[#allocation31_spill]] %s1638_s14  ;;  %s1661_s1 = sld [smem:[#allocation3 + $0x4]]  ;;  %v378_v45 = vstv %s1645_s19  ;;  %v390_v48 = vstv %s1651_s8 }
  0x87   : > { %2504 = sst [smem:[#allocation32_spill]] %s1641_s15  ;;  %s1664_s2 = sld [smem:[#allocation3 + $0x84]]  ;;  %v393_v49 = vstv %s1653_s16 }
  0x88   : > { %2505 = sst [smem:[#allocation33_spill]] %s1645_s19  ;;  %s1666_s4 = sld [smem:[#allocation7 + $0x4]]  ;;  %v382_v46 = vstv %s1647_s27 }
  0x89   : > { %2506 = sst [smem:[#allocation34_spill]] %s1647_s27  ;;  %s1668_s28 = sld [smem:[#allocation9 + $0x4]]  ;;  %v386_v47 = vstv %s1649_s26 }
  0x8a   : > { %v1171_v6 = vpop.eup %1170  ;;  %2507 = sst [smem:[#allocation35_spill]] %s1649_s26  ;;  %s1670_s22 = sld [smem:[#allocation3 + $0x5]]  ;;  %v397_v50 = vstv %s1655_s18 }
  0x8b   : > { %v1613_v9 = vmul.f32 %v1171_v6, %v297_v5  ;;  %2508 = sst [smem:[#allocation36_spill]] %s1653_s16  ;;  %v1173_v19 = vpop.eup %1172  ;;  %s1674_s21 = sld [smem:[#allocation3 + $0x85]]  ;;  %v401_v52 = vstv %s1659_s0 }
  0x8c   : > { %2509 = sst [smem:[#allocation37_spill]] %s1655_s18  ;;  %s1685_s20 = sld [smem:[#allocation3 + $0x6]]  ;;  %v289_v26 = vmul.f32 %v1173_v19, %v1619_v11  ;;  %v405_v53 = vstv %s1661_s1 }
  0x8d   : > { %v1617_v10 = vmul.f32 %v1613_v9, %v1613_v9  ;;  %2510 = sst [smem:[#allocation38_spill]] %s1659_s0  ;;  %s1676_s25 = sld [smem:[#allocation7 + $0x5]]  ;;  %v408_v57 = vstv %s1664_s2 }
  0x8e   : > { %2511 = sst [smem:[#allocation39_spill]] %s1664_s2  ;;  %s1683_s7 = sld [smem:[#allocation9 + $0x5]]  ;;  %v291_v31 = vsel %vm290_vm2, %v1619_v11, %v289_v26  ;;  %v412_v58 = vstv %s1666_s4 }
  0x8f   : > { %v302_v12 = vmul.f32 0.002785687, %v1617_v10  ;;  %2512 = sst [smem:[#allocation40_spill]] %s1666_s4  ;;  %s1689_s23 = sld [smem:[#allocation3 + $0x86]]  ;;  %v1734_v43 = vsel %vm292_vm3, %v293_v28, %v291_v31  ;;  %v416_v4 = vstv %s1668_s28 }
  0x90   : > { %2513 = sst [smem:[#allocation41_spill]] %s1668_s28  ;;  %s1691_s5 = sld [smem:[#allocation7 + $0x6]]  ;;  %v420_v54 = vstv %s1670_s22  ;;  %v1765_v55 = vmul.f32 %v345_v33, %v1734_v43  ;;  %v1768_v56 = vmul.f32 %v360_v38, %v1734_v43  ;;  %v1780_v60 = vmul.f32 %v375_v42, %v1734_v43 }
  0x91   : > { %v303_v13 = vadd.f32 -0.015866, %v302_v12  ;;  %2514 = sst [smem:[#allocation42_spill]] %s1674_s21  ;;  %s1693_s6 = sld [smem:[#allocation9 + $0x6]]  ;;  %v1783_v61 = vmul.f32 %v390_v48, %v1734_v43  ;;  %v1792_v63 = vmul.f32 %v405_v53, %v1734_v43  ;;  %v1796_v5 = vmul.f32 %v420_v54, %v1734_v43 }
  0x92   : > { %s1695_s3 = sld [smem:[#allocation3 + $0x7]]  ;;  %s1728_s24 = sld [smem:[#allocation3 + $0x89]]  ;;  %v435_v62 = vstv %s1685_s20  ;;  %v423_v8 = vstv %s1674_s21 }
  0x93   : > { %v304_v14 = vmul.f32 %v303_v13, %v1617_v10  ;;  %2515 = sst [smem:[#allocation43_spill]] %s1676_s25  ;;  %s1698_s29 = sld [smem:[#allocation3 + $0x87]]  ;;  %v1813_v13 = vmul.f32 %v435_v62, %v1734_v43 }
  0x94   : > { %2516 = sst [smem:[#allocation44_spill]] %s1683_s7  ;;  %s1700_s7 = sld [smem:[#allocation7 + $0x7]] }
  0x95   : > { %v305_v15 = vadd.f32 0.04247222, %v304_v14  ;;  %2517 = sst [smem:[#allocation45_spill]] %s1689_s23  ;;  %s1722_s23 = sld [smem:[#allocation3 + $0x9]] }
  0x96   : > { %2518 = sst [smem:[#allocation46_spill]] %s1691_s5  ;;  %s1707_s5 = sld [smem:[#allocation3 + $0x8]] }
  0x97   : > { %v306_v16 = vmul.f32 %v305_v15, %v1617_v10  ;;  %2519 = sst [smem:[#allocation47_spill]] %s1693_s6  ;;  %s1730_s30 = sld [smem:[#allocation7 + $0x9]] }
  0x98   : > { %s1705_s6 = sld [smem:[#allocation9 + $0x7]]  ;;  %s1739_s13 = sld [smem:[#allocation9 + $0x9]]  ;;  %v450_v6 = vstv %s1695_s3  ;;  %v483_v33 = vstv %s1728_s24 }
  0x99   : > { %v307_v17 = vadd.f32 -0.074975304, %v306_v16  ;;  %2520 = sst [smem:[#allocation48_spill]] %s1698_s29  ;;  %s1741_s10 = sld [smem:[#allocation3 + $0xa]] }
  0x9a   : > { %2521 = sst [smem:[#allocation49_spill]] %s1700_s7  ;;  %s1713_s7 = sld [smem:[#allocation3 + $0x88]] }
  0x9b   : > { %v308_v18 = vmul.f32 %v307_v17, %v1617_v10  ;;  %s1715_s29 = sld [smem:[#allocation7 + $0x8]]  ;;  %s1749_s17 = sld [smem:[#allocation3 + $0x8a]]  ;;  %v480_v19 = vstv %s1722_s23 }
  0x9c   : > { %s1751_s15 = sld [smem:[#allocation7 + $0xa]]  ;;  %s1758_s14 = sld [smem:[#allocation3 + $0xb]]  ;;  %v465_v11 = vstv %s1707_s5  ;;  %v1850_v31 = vmul.f32 %v480_v19, %v1734_v43 }
  0x9d   : > { %v309_v20 = vadd.f32 0.1064488, %v308_v18  ;;  %s1756_s27 = sld [smem:[#allocation9 + $0xa]]  ;;  %s1772_s1 = sld [smem:[#allocation3 + $0x8b]]  ;;  %v1824_v18 = vmul.f32 %v450_v6, %v1734_v43  ;;  %v1835_v24 = vmul.f32 %v465_v11, %v1734_v43  ;;  %v487_v42 = vstv %s1730_s30 }
  0x9e   : > { %2522 = sst [smem:[#allocation50_spill]] %s1705_s6  ;;  %s1720_s6 = sld [smem:[#allocation9 + $0x8]] }
  0x9f   : > { %v310_v23 = vmul.f32 %v309_v20, %v1617_v10  ;;  %2525 = sst [smem:[#allocation53_spill]] %s1739_s13  ;;  %s1774_s22 = sld [smem:[#allocation7 + $0xb]]  ;;  %v495_v28 = vstv %s1741_s10 }
  0xa0   : > { %s1786_s0 = sld [smem:[#allocation9 + $0xb]]  ;;  %s1788_s26 = sld [smem:[#allocation3 + $0xc]]  ;;  %v468_v26 = vstv %s1713_s7  ;;  %v1869_v53 = vmul.f32 %v495_v28, %v1734_v43 }
  0xa1   : > { %v311_v27 = vadd.f32 -0.14207031, %v310_v23  ;;  %2523 = sst [smem:[#allocation51_spill]] %s1715_s29  ;;  %s2530_s4 = sld [smem:[#allocation45_spill]]  ;;  %v498_v54 = vstv %s1749_s17 }
  0xa2   : > { %s2531_s18 = sld [smem:[#allocation46_spill]]  ;;  %s1799_s2 = sld [smem:[#allocation3 + $0x8c]] }
  0xa3   : > { %v312_v29 = vmul.f32 %v311_v27, %v1617_v10  ;;  %2526 = sst [smem:[#allocation54_spill]] %s1756_s27  ;;  %s1801_s20 = sld [smem:[#allocation7 + $0xc]]  ;;  %v472_v27 = vstv %s1715_s29  ;;  %v513_v11 = vstv %s1772_s1 }
  0xa4   : > { %2524 = sst [smem:[#allocation52_spill]] %s1720_s6  ;;  %s2534_s16 = sld [smem:[#allocation48_spill]] }
  0xa5   : > { %v313_v35 = vadd.f32 0.19993454, %v312_v29  ;;  %2527 = sst [smem:[#allocation55_spill]] %s1774_s22  ;;  %s2535_s19 = sld [smem:[#allocation49_spill]] }
  0xa6   : > { %2529 = sst [smem:[#allocation56_spill]] %s1786_s0  ;;  %s1807_s11 = sld [smem:[#allocation9 + $0xc]]  ;;  %v525_v48 = vstv %s1788_s26 }
  0xa7   : > { %v314_v44 = vmul.f32 %v313_v35, %v1617_v10  ;;  %s1809_s12 = sld [smem:[#allocation3 + $0xd]]  ;;  %v438_v14 = vstv %s2530_s4  ;;  %s1829_s8 = sld [smem:[#allocation3 + $0xe]]  ;;  %v510_v35 = vstv %s1758_s14 }
  0xa8   : > { %v442_v15 = vstv %s2531_s18  ;;  %s1817_s3 = sld [smem:[#allocation3 + $0x8d]]  ;;  %s1837_s18 = sld [smem:[#allocation3 + $0x8e]] }
  0xa9   : > { %v315_v51 = vadd.f32 -0.33333147, %v314_v44  ;;  %2533 = sst [smem:[#allocation45_spill]] %s1801_s20  ;;  %s1839_s9 = sld [smem:[#allocation3 + $0xf]]  ;;  %v528_v44 = vstv %s1799_s2  ;;  %v532_v0 = vstv %s1801_s20 }
  0xaa   : > { %s1819_s21 = sld [smem:[#allocation7 + $0xd]]  ;;  %v453_v20 = vstv %s2534_s16  ;;  %s1844_s23 = sld [smem:[#allocation7 + $0xe]] }
  0xab   : > { %v316_v59 = vmul.f32 %v315_v51, %v1617_v10  ;;  %v427_v10 = vstv %s1676_s25  ;;  %s1827_s5 = sld [smem:[#allocation9 + $0xd]]  ;;  %v457_v21 = vstv %s2535_s19  ;;  %s1846_s25 = sld [smem:[#allocation9 + $0xe]] }
  0xac   : > { %2536 = sst [smem:[#allocation48_spill]] %s1807_s11  ;;  %s1854_s28 = sld [smem:[#allocation3 + $0x8f]] }
  0xad   : > { %v317_v7 = vmul.f32 %v316_v59, %v1613_v9  ;;  %s1856_s19 = sld [smem:[#allocation3 + $0x10]]  ;;  %s1864_s10 = sld [smem:[#allocation7 + $0xf]]  ;;  %v502_v59 = vstv %s1751_s15 }
  0xae   : > { %s1866_s6 = sld [smem:[#allocation9 + $0xf]]  ;;  %s1873_s14 = sld [smem:[#allocation3 + $0x90]]  ;;  %v543_v29 = vstv %s1817_s3 }
  0xaf   : > { %v318_v16 = vadd.f32 %v317_v7, %v1613_v9  ;;  %s1875_s29 = sld [smem:[#allocation3 + $0x11]]  ;;  %v1889_v7 = vmul.f32 %v510_v35, %v1734_v43  ;;  %s1893_s26 = sld [smem:[#allocation7 + $0x10]]  ;;  %v1906_v35 = vmul.f32 %v525_v48, %v1734_v43  ;;  %v570_v48 = vstv %s1839_s9 }
  0xb0   : > { %2538 = sst [smem:[#allocation57_spill]] %s1819_s21  ;;  %s1895_s13 = sld [smem:[#allocation9 + $0x10]] }
  0xb1   : > { %2539 = sst [smem:[#allocation58_spill]] %s1827_s5  ;;  %v320_v9 = vsub.f32 1.5707964, %v318_v16  ;;  %s1934_s9 = sld [smem:[#allocation7 + $0x11]] }
  0xb2   : > { %2540 = sst [smem:[#allocation59_spill]] %s1844_s23  ;;  %v573_v23 = vstv %s1854_s28  ;;  %s1942_s21 = sld [smem:[#allocation9 + $0x11]] }
  0xb3   : > { %2541 = sst [smem:[#allocation60_spill]] %s1846_s25  ;;  %v321_v38 = vsel %vm319_vm4, %v320_v9, %v318_v16  ;;  %v540_v16 = vstv %s1809_s12  ;;  %v517_v9 = vstv %s1774_s22  ;;  %s1925_s12 = sld [smem:[#allocation3 + $0x91]]  ;;  %v585_v3 = vstv %s1856_s19 }
  0xb4   : > { %2542 = sst [smem:[#allocation61_spill]] %s1864_s10  ;;  %v323_v51 = vsub.f32 3.1415927, %v321_v38  ;;  %s1944_s22 = sld [smem:[#allocation3 + $0x13]] }
  0xb5   : > { %2543 = sst [smem:[#allocation62_spill]] %s1866_s6  ;;  %v600_v17 = vstv %s1875_s29  ;;  %v592_v12 = vstv %s1893_s26  ;;  %s1959_s25 = sld [smem:[#allocation3 + $0x92]] }
  0xb6   : > { %2546 = sst [smem:[#allocation63_spill]] %s1893_s26  ;;  %v324_v19 = vsel %vm322_vm1, %v323_v51, %v321_v38  ;;  %v555_v38 = vstv %s1829_s8  ;;  %v1918_v51 = vmul.f32 %v540_v16, %v1734_v43  ;;  %s1927_s8 = sld [smem:[#allocation3 + $0x12]]  ;;  %v558_v16 = vstv %s1837_s18 }
  0xb7   : > { %2547 = sst [smem:[#allocation64_spill]] %s1895_s13  ;;  %v328_v6 = vsel %vm327_vm9, %v1672_v22, %v324_v19  ;;  %v1939_v19 = vmul.f32 %v570_v48, %v1734_v43  ;;  %v1954_v48 = vmul.f32 %v585_v3, %v1734_v43  ;;  %s1961_s23 = sld [smem:[#allocation7 + $0x12]] }
  0xb8   : > { %v332_v2 = vsel %vm1883_vm10, nan, %v328_v6  ;;  %v1930_v6 = vmul.f32 %v555_v38, %v1734_v43  ;;  %v577_v38 = vstv %s1864_s10  ;;  %s1987_s11 = sld [smem:[#allocation9 + $0x12]]  ;;  %s1989_s5 = sld [smem:[#allocation3 + $0x14]] }
  0xb9   : > { %v338_v28 = vsel %vm337_vm11, %v1681_v25, %v332_v2  ;;  %v588_v25 = vstv %s1873_s14  ;;  %s1995_s4 = sld [smem:[#allocation3 + $0x93]]  ;;  %s2007_s26 = sld [smem:[#allocation3 + $0x15]] }
  0xba   : > { %v339_v62 = vand.u32 2147483647, %v338_v28  ;;  %s1997_s19 = sld [smem:[#allocation7 + $0x13]]  ;;  %s2023_s10 = sld [smem:[#allocation7 + $0x14]] }
  0xbb   : > { %s2005_s6 = sld [smem:[#allocation9 + $0x13]]  ;;  %s2031_s29 = sld [smem:[#allocation9 + $0x14]] }
  0xbc   : > { %v1948_v28 = vor.u32 %v340_v30, %v339_v62  ;;  %s2033_s0 = sld [smem:[#allocation3 + $0x16]]  ;;  %s2040_s13 = sld [smem:[#allocation3 + $0x95]] }
  0xbd   : > { %s2042_s27 = sld [smem:[#allocation7 + $0x15]]  ;;  %s2055_s20 = sld [smem:[#allocation3 + $0x17]] }
  0xbe   : > { %v349_v1 = vmul.f32 %v348_v34, %v1948_v28  ;;  %v364_v30 = vmul.f32 %v363_v39, %v1948_v28  ;;  %v379_v62 = vmul.f32 %v378_v45, %v1948_v28  ;;  %v394_v3 = vmul.f32 %v393_v49, %v1948_v28  ;;  %s2069_s16 = sld [smem:[#allocation7 + $0x16]]  ;;  %s2085_s17 = sld [smem:[#allocation3 + $0x18]] }
  0xbf   : > { %v409_v22 = vmul.f32 %v408_v57, %v1948_v28  ;;  %v424_v2 = vmul.f32 %v423_v8, %v1948_v28  ;;  %v439_v34 = vmul.f32 %v438_v14, %v1948_v28  ;;  %v1985_v39 = vmul.f32 %v600_v17, %v1734_v43  ;;  %s2097_s1 = sld [smem:[#allocation3 + $0x97]]  ;;  %s2114_s24 = sld [smem:[#allocation3 + $0x19]] }
  0xc0   : > { %v350_v45 = vadd.f32 %v349_v1, %v1765_v55  ;;  %v365_v49 = vadd.f32 %v364_v30, %v1768_v56  ;;  %v380_v57 = vadd.f32 %v379_v62, %v1780_v60  ;;  %v395_v8 = vadd.f32 %v394_v3, %v1783_v61  ;;  %s2131_s2 = sld [smem:[#allocation7 + $0x18]]  ;;  %s2571_s18 = sld [smem:[#allocation57_spill]] }
  0xc1   : > { %v410_v14 = vadd.f32 %v409_v22, %v1792_v63  ;;  %v454_v17 = vmul.f32 %v453_v20, %v1948_v28  ;;  %v603_v55 = vstv %s1925_s12  ;;  %v615_v1 = vstv %s1927_s8  ;;  %s2021_s8 = sld [smem:[#allocation3 + $0x94]]  ;;  %s2145_s7 = sld [smem:[#allocation3 + $0x1a]] }
  0xc2   : > { %v353_v56 = vadd.f32 %v352_v36, %v350_v45  ;;  %v368_v60 = vadd.f32 %v367_v40, %v365_v49  ;;  %v383_v61 = vadd.f32 %v382_v46, %v380_v57  ;;  %v425_v63 = vadd.f32 %v424_v2, %v1796_v5  ;;  %s2573_s28 = sld [smem:[#allocation59_spill]]  ;;  %s2574_s30 = sld [smem:[#allocation47_spill]] }
  0xc3   : > { %v398_v20 = vadd.f32 %v397_v50, %v395_v8  ;;  %v607_v22 = vstv %s1934_s9  ;;  %v611_v30 = vstv %s1942_s21  ;;  %v630_v62 = vstv %s1944_s22  ;;  %s2099_s22 = sld [smem:[#allocation7 + $0x17]]  ;;  %s2578_s3 = sld [smem:[#allocation50_spill]] }
  0xc4   : > { %1174 = vtanh.f32 %v353_v56  ;;  %v413_v36 = vadd.f32 %v412_v58, %v410_v14  ;;  %v440_v40 = vadd.f32 %v439_v34, %v1813_v13  ;;  %v469_v46 = vmul.f32 %v468_v26, %v1948_v28  ;;  %s2584_s15 = sld [smem:[#allocation53_spill]]  ;;  %s2229_s9 = sld [smem:[#allocation3 + $0x1c]] }
  0xc5   : > { %1176 = vtanh.f32 %v368_v60  ;;  %v2036_v50 = vmul.f32 %v615_v1, %v1734_v43  ;;  %v618_v5 = vstv %s1959_s25  ;;  %v622_v2 = vstv %s1961_s23  ;;  %s2197_s25 = sld [smem:[#allocation3 + $0x9a]]  ;;  %s2590_s23 = sld [smem:[#allocation48_spill]] }
  0xc6   : > { %1178 = vtanh.f32 %v383_v61  ;;  %v428_v58 = vadd.f32 %v427_v10, %v425_v63  ;;  %v455_v13 = vadd.f32 %v454_v17, %v1824_v18  ;;  %v484_v26 = vmul.f32 %v483_v33, %v1948_v28  ;;  %s2596_s14 = sld [smem:[#allocation62_spill]]  ;;  %s2297_s12 = sld [smem:[#allocation9 + $0x15]] }
  0xc7   : > { %1180 = vtanh.f32 %v398_v20  ;;  %v626_v3 = vstv %s1987_s11  ;;  %v2052_v34 = vmul.f32 %v630_v62, %v1734_v43  ;;  %v645_v45 = vstv %s1989_s5  ;;  %s2067_s5 = sld [smem:[#allocation3 + $0x96]]  ;;  %s2328_s21 = sld [smem:[#allocation9 + $0x18]] }
  0xc8   : > { %1182 = vtanh.f32 %v413_v36  ;;  %v443_v10 = vadd.f32 %v442_v15, %v440_v40  ;;  %v470_v18 = vadd.f32 %v469_v46, %v1835_v24  ;;  %v499_v33 = vmul.f32 %v498_v54, %v1948_v28  ;;  %s2336_s11 = sld [smem:[#allocation9 + $0x19]] }
  0xc9   : > { %v633_v49 = vstv %s1995_s4  ;;  %v637_v57 = vstv %s1997_s19  ;;  %v641_v8 = vstv %s2005_s6  ;;  %v660_v14 = vstv %s2007_s26  ;;  %s2129_s26 = sld [smem:[#allocation3 + $0x98]]  ;;  %s2586_s4 = sld [smem:[#allocation54_spill]] }
  0xca   : > { %1184 = vtanh.f32 %v428_v58  ;;  %v458_v15 = vadd.f32 %v457_v21, %v455_v13  ;;  %v485_v24 = vadd.f32 %v484_v26, %v1850_v31  ;;  %v514_v54 = vmul.f32 %v513_v11, %v1948_v28  ;;  %s2592_s19 = sld [smem:[#allocation58_spill]]  ;;  %s2346_s6 = sld [smem:[#allocation9 + $0x1b]] }
  0xcb   : > { %v529_v17 = vmul.f32 %v528_v44, %v1948_v28  ;;  %v2081_v1 = vmul.f32 %v645_v45, %v1734_v43  ;;  %v648_v56 = vstv %s2021_s8  ;;  %v652_v60 = vstv %s2023_s10  ;;  %s2219_s8 = sld [smem:[#allocation3 + $0x9b]]  ;;  %s2594_s10 = sld [smem:[#allocation60_spill]] }
  0xcc   : > { %1186 = vtanh.f32 %v443_v10  ;;  %v473_v21 = vadd.f32 %v472_v27, %v470_v18  ;;  %v500_v31 = vadd.f32 %v499_v33, %v1869_v53  ;;  %v675_v61 = vstv %s2033_s0  ;;  %s2572_s0 = sld [smem:[#allocation44_spill]] }
  0xcd   : > { %v656_v11 = vstv %s2031_s29  ;;  %v2093_v44 = vmul.f32 %v660_v14, %v1734_v43  ;;  %v663_v63 = vstv %s2040_s13  ;;  %v667_v20 = vstv %s2042_s27  ;;  %s2227_s13 = sld [smem:[#allocation7 + $0x1b]]  ;;  %s2274_s27 = sld [smem:[#allocation3 + $0x1f]] }
  0xce   : > { %v1175_v62 = vpop.eup %1174  ;;  %1188 = vtanh.f32 %v458_v15  ;;  %v488_v27 = vadd.f32 %v487_v42, %v485_v24  ;;  %v515_v53 = vadd.f32 %v514_v54, %v1889_v7  ;;  %v544_v36 = vmul.f32 %v543_v29, %v1948_v28  ;;  %s1071_s29 = sld [smem:[#allocation9 + $0x1c]] }
  0xcf   : > { %v1177_v40 = vpop.eup %1176  ;;  %v357_v46 = vmul.f32 %v1175_v62, %v356_v37  ;;  %v530_v58 = vadd.f32 %v529_v17, %v1906_v35  ;;  %v2111_v13 = vmul.f32 %v675_v61, %v1734_v43  ;;  %v690_v26 = vstv %s2055_s20  ;;  %s2582_s20 = sld [smem:[#allocation52_spill]] }
  0xd0   : > { %v1179_v42 = vpop.eup %1178  ;;  %v372_v7 = vmul.f32 %v1177_v40, %v371_v41  ;;  %1190 = vtanh.f32 %v473_v21  ;;  %v503_v29 = vadd.f32 %v502_v59, %v500_v31  ;;  %v559_v37 = vmul.f32 %v558_v16, %v1948_v28 }
  0xd1   : > { %v1181_v35 = vpop.eup %1180  ;;  %v358_v45 = vadd.f32 %v357_v46, %v343_v32  ;;  %v387_v10 = vmul.f32 %v1179_v42, %v386_v47  ;;  %v678_v18 = vstv %s2067_s5  ;;  %v682_v33 = vstv %s2069_s16  ;;  %s2239_s5 = sld [smem:[#allocation3 + $0x9c]] }
  0xd2   : > { %v1183_v41 = vpop.eup %1182  ;;  %1192 = vtanh.f32 %v488_v27  ;;  %v518_v59 = vadd.f32 %v517_v9, %v515_v53  ;;  %v545_v16 = vadd.f32 %v544_v36, %v1918_v51  ;;  %v574_v32 = vmul.f32 %v573_v23, %v1948_v28  ;;  %s2285_s16 = sld [smem:[#allocation7 + $0x1c]] }
  0xd3   : > { %v373_v47 = vadd.f32 %v372_v7, %v358_v45  ;;  %v402_v14 = vmul.f32 %v1181_v35, %v401_v52  ;;  %v2142_v15 = vmul.f32 %v690_v26, %v1734_v43  ;;  %v705_v24 = vstv %s2085_s17  ;;  %s2157_s17 = sld [smem:[#allocation3 + $0x99]] }
  0xd4   : > { %v1185_v54 = vpop.eup %1184  ;;  %1194 = vtanh.f32 %v503_v29  ;;  %v533_v9 = vadd.f32 %v532_v0, %v530_v58  ;;  %v560_v51 = vadd.f32 %v559_v37, %v1930_v6  ;;  %v589_v23 = vmul.f32 %v588_v25, %v1948_v28 }
  0xd5   : > { %v388_v52 = vadd.f32 %v387_v10, %v373_v47  ;;  %v417_v17 = vmul.f32 %v1183_v41, %v416_v4  ;;  %v693_v21 = vstv %s2097_s1  ;;  %v697_v31 = vstv %s2099_s22  ;;  %s2171_s1 = sld [smem:[#allocation7 + $0x19]]  ;;  %s2295_s22 = sld [smem:[#allocation7 + $0x1d]] }
  0xd6   : > { %v1187_v61 = vpop.eup %1186  ;;  %1196 = vtanh.f32 %v518_v59  ;;  %v2575_v62 = vstv %s2571_s18  ;;  %v575_v6 = vadd.f32 %v574_v32, %v1939_v19  ;;  %v604_v25 = vmul.f32 %v603_v55, %v1948_v28  ;;  %s2588_s18 = sld [smem:[#allocation56_spill]] }
  0xd7   : > { %v548_v0 = vadd.f32 %v2575_v62, %v545_v16  ;;  %v403_v27 = vadd.f32 %v402_v14, %v388_v52  ;;  %v2576_v4 = vstv %s2572_s0  ;;  %v2168_v36 = vmul.f32 %v705_v24, %v1734_v43  ;;  %s2251_s0 = sld [smem:[#allocation3 + $0x9d]] }
  0xd8   : > { %v432_v53 = vmul.f32 %v1185_v54, %v2576_v4  ;;  %v720_v40 = vstv %s2114_s24  ;;  %v1189_v46 = vpop.eup %1188  ;;  %1198 = vtanh.f32 %v533_v9  ;;  %v2579_v58 = vstv %s2573_s28  ;;  %s2183_s24 = sld [smem:[#allocation3 + $0x1b]]  ;;  %s2262_s28 = sld [smem:[#allocation3 + $0x1e]] }
  0xd9   : > { %v563_v26 = vadd.f32 %v2579_v58, %v560_v51  ;;  %v590_v19 = vadd.f32 %v589_v23, %v1954_v48  ;;  %v619_v55 = vmul.f32 %v618_v5, %v1948_v28  ;;  %v418_v42 = vadd.f32 %v417_v17, %v403_v27 }
  0xda   : > { %v2580_v7 = vstv %s2574_s30  ;;  %v708_v37 = vstv %s2129_s26  ;;  %v712_v35 = vstv %s2131_s2  ;;  %v1191_v45 = vpop.eup %1190  ;;  %1200 = vtanh.f32 %v548_v0  ;;  %s2199_s26 = sld [smem:[#allocation7 + $0x1a]]  ;;  %s2276_s30 = sld [smem:[#allocation3 + $0x9f]] }
  0xdb   : > { %v447_v29 = vmul.f32 %v1187_v61, %v2580_v7  ;;  %v578_v10 = vadd.f32 %v577_v38, %v575_v6  ;;  %v605_v48 = vadd.f32 %v604_v25, %v1985_v39  ;;  %v634_v5 = vmul.f32 %v633_v49, %v1948_v28  ;;  %s2307_s2 = sld [smem:[#allocation7 + $0x1e]] }
  0xdc   : > { %v433_v41 = vadd.f32 %v432_v53, %v418_v42  ;;  %v2583_v59 = vstv %s2578_s3  ;;  %v2194_v32 = vmul.f32 %v720_v40, %v1734_v43  ;;  %v735_v47 = vstv %s2145_s7  ;;  %v1193_v38 = vpop.eup %1192  ;;  %s2249_s7 = sld [smem:[#allocation3 + $0x1d]]  ;;  %s2598_s3 = sld [smem:[#allocation64_spill]] }
  0xdd   : > { %v462_v16 = vmul.f32 %v1189_v46, %v2583_v59  ;;  %1202 = vtanh.f32 %v563_v26  ;;  %v593_v39 = vadd.f32 %v592_v12, %v590_v19  ;;  %v620_v49 = vadd.f32 %v619_v55, %v2036_v50 }
  0xde   : > { %v649_v14 = vmul.f32 %v648_v56, %v1948_v28  ;;  %v448_v24 = vadd.f32 %v447_v29, %v433_v41  ;;  %v2585_v54 = vstv %s2582_s20  ;;  %v664_v51 = vmul.f32 %v663_v63, %v1948_v28  ;;  %v1195_v52 = vpop.eup %1194  ;;  %s2319_s20 = sld [smem:[#allocation9 + $0x17]] }
  0xdf   : > { %v477_v9 = vmul.f32 %v1191_v45, %v2585_v54  ;;  %v723_v23 = vstv %s2157_s17  ;;  %1204 = vtanh.f32 %v578_v10  ;;  %v608_v17 = vadd.f32 %v607_v22, %v605_v48  ;;  %s2264_s17 = sld [smem:[#allocation3 + $0x9e]] }
  0xe0   : > { %v635_v12 = vadd.f32 %v634_v5, %v2052_v34  ;;  %v679_v50 = vmul.f32 %v678_v18, %v1948_v28  ;;  %v463_v56 = vadd.f32 %v462_v16, %v448_v24  ;;  %v2587_v61 = vstv %s2584_s15  ;;  %v1197_v22 = vpop.eup %1196  ;;  %s1079_s15 = sld [smem:[#allocation9 + $0x1e]] }
  0xe1   : > { %v492_v62 = vmul.f32 %v1193_v38, %v2587_v61  ;;  %v727_v0 = vstv %s2171_s1  ;;  %v2225_v63 = vmul.f32 %v735_v47, %v1734_v43  ;;  %1206 = vtanh.f32 %v593_v39  ;;  %s2317_s1 = sld [smem:[#allocation7 + $0x1f]] }
  0xe2   : > { %v623_v34 = vadd.f32 %v622_v2, %v620_v49  ;;  %v650_v18 = vadd.f32 %v649_v14, %v2081_v1  ;;  %v694_v6 = vmul.f32 %v693_v21, %v1948_v28  ;;  %v478_v25 = vadd.f32 %v477_v9, %v463_v56  ;;  %v1199_v46 = vpop.eup %1198 }
  0xe3   : > { %v2589_v27 = vstv %s2586_s4  ;;  %v665_v53 = vadd.f32 %v664_v51, %v2093_v44  ;;  %v750_v40 = vstv %s2183_s24  ;;  %1208 = vtanh.f32 %v608_v17  ;;  %s2309_s24 = sld [smem:[#allocation9 + $0x16]]  ;;  %s1083_s4 = sld [smem:[#allocation9 + $0x1f]] }
  0xe4   : > { %v507_v4 = vmul.f32 %v1195_v52, %v2589_v27  ;;  %v638_v58 = vadd.f32 %v637_v57, %v635_v12  ;;  %v680_v2 = vadd.f32 %v679_v50, %v2111_v13  ;;  %v709_v1 = vmul.f32 %v708_v37, %v1948_v28  ;;  %v1201_v44 = vpop.eup %1200 }
  0xe5   : > { %v493_v21 = vadd.f32 %v492_v62, %v478_v25  ;;  %v2591_v26 = vstv %s2588_s18  ;;  %v738_v55 = vstv %s2197_s25  ;;  %v742_v42 = vstv %s2199_s26  ;;  %s2342_s25 = sld [smem:[#allocation9 + $0x1a]]  ;;  %s1075_s26 = sld [smem:[#allocation9 + $0x1d]] }
  0xe6   : > { %v522_v19 = vmul.f32 %v1197_v22, %v2591_v26  ;;  %1210 = vtanh.f32 %v623_v34  ;;  %v653_v57 = vadd.f32 %v652_v60, %v650_v18  ;;  %v695_v13 = vadd.f32 %v694_v6, %v2142_v15 }
  0xe7   : > { %v724_v7 = vmul.f32 %v723_v23, %v1948_v28  ;;  %v508_v29 = vadd.f32 %v507_v4, %v493_v21  ;;  %v2593_v37 = vstv %s2590_s23  ;;  %v668_v10 = vadd.f32 %v667_v20, %v665_v53  ;;  %v1203_v5 = vpop.eup %1202 }
  0xe8   : > { %v537_v45 = vmul.f32 %v1199_v46, %v2593_v37  ;;  %v751_v48 = vmul.f32 %v750_v40, %v1734_v43  ;;  %1212 = vtanh.f32 %v638_v58  ;;  %v683_v60 = vadd.f32 %v682_v33, %v680_v2 }
  0xe9   : > { %v710_v15 = vadd.f32 %v709_v1, %v2168_v36  ;;  %v753_v41 = vstv %s2219_s8  ;;  %v523_v59 = vadd.f32 %v522_v19, %v508_v29  ;;  %v2595_v16 = vstv %s2592_s19  ;;  %v1205_v39 = vpop.eup %1204  ;;  %s2601_s8 = sld [smem:[#allocation25_spill]] }
  0xea   : > { %v552_v47 = vmul.f32 %v1201_v44, %v2595_v16  ;;  %v757_v20 = vstv %s2227_s13  ;;  %v765_v38 = vstv %s2229_s9  ;;  %1214 = vtanh.f32 %v653_v57  ;;  %s2602_s13 = sld [smem:[#allocation20_spill]]  ;;  %s2603_s9 = sld [smem:[#allocation23_spill]] }
  0xeb   : > { %v698_v33 = vadd.f32 %v697_v31, %v695_v13  ;;  %v725_v36 = vadd.f32 %v724_v7, %v2194_v32  ;;  %v739_v49 = vmul.f32 %v738_v55, %v1948_v28  ;;  %v538_v14 = vadd.f32 %v537_v45, %v523_v59  ;;  %v1207_v51 = vpop.eup %1206 }
  0xec   : > { %v2597_v24 = vstv %s2594_s10  ;;  %1216 = vtanh.f32 %v668_v10  ;;  %v768_v9 = vstv %s2239_s5  ;;  %v713_v23 = vadd.f32 %v712_v35, %v710_v15 }
  0xed   : > { %v567_v54 = vmul.f32 %v1203_v5, %v2597_v24  ;;  %1218 = vtanh.f32 %v683_v60  ;;  %v754_v31 = vmul.f32 %v753_v41, %v1948_v28  ;;  %v766_v32 = vmul.f32 %v765_v38, %v1734_v43  ;;  %v1209_v61 = vpop.eup %1208 }
  0xee   : > { %v553_v52 = vadd.f32 %v552_v47, %v538_v14  ;;  %v2599_v17 = vstv %s2596_s14  ;;  %v780_v50 = vstv %s2249_s7  ;;  %v783_v56 = vstv %s2251_s0 }
  0xef   : > { %v582_v12 = vmul.f32 %v1205_v39, %v2599_v17  ;;  %1220 = vtanh.f32 %v698_v33  ;;  %v728_v35 = vadd.f32 %v727_v0, %v725_v36  ;;  %v740_v62 = vadd.f32 %v739_v49, %v2225_v63  ;;  %s957_s18 = sshll.u32 %s2601_s8, 3  ;;  %s830_s10 = scalar_lea.sflag [#allocation5], %s2601_s8 }
  0xf0   : > { %v769_v22 = vmul.f32 %v768_v9, %v1948_v28  ;;  %v568_v34 = vadd.f32 %v567_v54, %v553_v52  ;;  %v2600_v18 = vstv %s2598_s3  ;;  %v795_v25 = vstv %s2262_s28  ;;  %v1211_v4 = vpop.eup %1210  ;;  %s1085_s5 = sshll.u32 %s2602_s13, 7  ;;  %s281_s23 = scalar_lea.vmem [#allocation11], %s957_s18 }
  0xf1   : > { %v597_v6 = vmul.f32 %v1207_v51, %v2600_v18  ;;  %v798_v27 = vstv %s2264_s17  ;;  %1222 = vtanh.f32 %v713_v23  ;;  %v755_v0 = vadd.f32 %v754_v31, %v751_v48  ;;  %s843_s7 = sshll.u32 %s281_s23, 4  ;;  %s2604_s28 = sld [smem:[#allocation69_spill]]  ;;  %s2359_s7 = int_to_ptr.vmem [resolvable:$true] %s843_s7 }
  0xf2   : > { %v781_v53 = vmul.f32 %v780_v50, %v1734_v43  ;;  %v784_v63 = vmul.f32 %v783_v56, %v1948_v28  ;;  %v583_v40 = vadd.f32 %v582_v12, %v568_v34  ;;  %v612_v46 = vmul.f32 %v1209_v61, %v611_v30  ;;  %v1213_v1 = vpop.eup %1212  ;;  %p2605_p1 = scmp.ne.s32.totalorder %s2603_s9, 0 }
  0xf3   : > { %v810_v58 = vstv %s2274_s27  ;;  %v813_v2 = vstv %s2276_s30  ;;  %v743_v21 = vadd.f32 %v742_v42, %v740_v62  ;;  %v770_v26 = vadd.f32 %v769_v22, %v766_v32  ;;  %s1315_s27 = scalar_lea.vmem %s2359_s7, 128  ;;  %s1400_s30 = smov [#allocation11]  }
  0xf4   : > { %v796_v19 = vmul.f32 %v795_v25, %v1734_v43  ;;  %v799_v55 = vmul.f32 %v798_v27, %v1948_v28  ;;  %v598_v44 = vadd.f32 %v597_v6, %v583_v40  ;;  %v627_v30 = vmul.f32 %v1211_v4, %v626_v3  ;;  %v1215_v13 = vpop.eup %1214  ;;  %p1316_p10 = scmp.ne.s32.totalorder %s2359_s7, %s1315_s27  ;;  %s1319_s14 = sshll.u32 %s1400_s30, 4  ;;  %s1320_s14 = int_to_ptr.vmem [resolvable:$false] %s1319_s14 }
  0xf5   : > { %1224 = vtanh.f32 %v728_v35  ;;  %v772_v57 = vstv %s2285_s16  ;;  %v758_v7 = vadd.f32 %v757_v20, %v755_v0  ;;  %v785_v42 = vadd.f32 %v784_v63, %v781_v53  ;;  %s1321_s16 = scalar_lea.vmem %s1320_s14, 256  ;;  %p1322_p6 = scmp.lt.s32.totalorder %s2359_s7, %s1320_s14 }
  0xf6   : > { %v811_v29 = vmul.f32 %v810_v58, %v1734_v43  ;;  %v814_v37 = vmul.f32 %v813_v2, %v1948_v28  ;;  %v1217_v45 = vpop.eup %1216  ;;  %v613_v10 = vadd.f32 %v612_v46, %v598_v44  ;;  %v642_v48 = vmul.f32 %v1213_v1, %v641_v8  ;;  %p1317_p5 = pnand %p1316_p10, %p2605_p1  ;;  %p1323_p3 = scmp.lt.s32.totalorder %s1321_s16, %s1315_s27 }
  0xf7   : > { %v787_v5 = vstv %s2295_s22  ;;  %v1219_v3 = vpop.eup %1218  ;;  %v671_v60 = vstv %s2297_s12  ;;  %1226 = vtanh.f32 %v743_v21  ;;  %v773_v15 = vadd.f32 %v772_v57, %v770_v26  ;;  %s2357_s17 = scalar_lea.hbm %s2604_s28, %s1085_s5 }
  0xf8   : > { %v800_v41 = vadd.f32 %v799_v55, %v796_v19  ;;  %v628_v59 = vadd.f32 %v627_v30, %v613_v10  ;;  %v657_v43 = vmul.f32 %v1215_v13, %v656_v11  ;;  %v802_v16 = vstv %s2307_s2  ;;  %p1318_p0 = pneg %p1317_p5  ;;  %p1324_p7 = por %p1323_p3, %p1322_p6 }
  0xf9   : > { %v1221_v47 = vpop.eup %1220  ;;  %v686_v28 = vstv %s2309_s24  ;;  %1228 = vtanh.f32 %v758_v7  ;;  %v788_v8 = vadd.f32 %v787_v5, %v785_v42  ;;  %v815_v20 = vadd.f32 %v814_v37, %v811_v29 }
  0xfa   : > { %v643_v38 = vadd.f32 %v642_v48, %v628_v59  ;;  %v672_v39 = vmul.f32 %v1217_v45, %v671_v60  ;;  %v817_v33 = vstv %s2317_s1  ;;  %v701_v49 = vstv %s2319_s20  ;;  %p1325_p9 = pnand %p1324_p7, %p1318_p0 }
  0xfb   : > { %v1223_v36 = vpop.eup %1222  ;;  %1230 = vtanh.f32 %v773_v15  ;;  %v803_v14 = vadd.f32 %v802_v16, %v800_v41  ;;  %v687_v24 = vmul.f32 %v1219_v3, %v686_v28  ;;  %v716_v54 = vstv %s2328_s21 }
  0xfc   : > { %v658_v11 = vadd.f32 %v657_v43, %v643_v38  ;;  %1232 = vtanh.f32 %v788_v8  ;;  %v818_v9 = vadd.f32 %v817_v33, %v815_v20  ;;  %v702_v31 = vmul.f32 %v1221_v47, %v701_v49 }
  0xfd   : > { %v731_v32 = vstv %s2336_s11  ;;  %1234 = vtanh.f32 %v803_v14  ;;  %v717_v17 = vmul.f32 %v1223_v36, %v716_v54  ;;  %v746_v50 = vstv %s2342_s25 }
  0xfe   : > { %v673_v23 = vadd.f32 %v672_v39, %v658_v11  ;;  %1236 = vtanh.f32 %v818_v9  ;;  %v761_v62 = vstv %s2346_s6  ;;  %v776_v6 = vstv %s1071_s29 }
  0xff   : > { %v1225_v51 = vpop.eup %1224  ;;  %v791_v0 = vstv %s1075_s26  ;;  %v806_v46 = vstv %s1079_s15  ;;  %v821_v21 = vstv %s1083_s4 }
 0x100   : > { %v688_v52 = vadd.f32 %v687_v24, %v673_v23  ;;  %v732_v61 = vmul.f32 %v1225_v51, %v731_v32 }
 0x101   : > { %v1227_v12 = vpop.eup %1226 }
 0x102   : > { %v703_v56 = vadd.f32 %v702_v31, %v688_v52  ;;  %v747_v34 = vmul.f32 %v1227_v12, %v746_v50 }
 0x103   : > { %v1229_v35 = vpop.eup %1228 }
 0x104   : > { %v718_v22 = vadd.f32 %v717_v17, %v703_v56  ;;  %v762_v27 = vmul.f32 %v1229_v35, %v761_v62 }
 0x105   : > { %v1231_v18 = vpop.eup %1230 }
 0x106   : > { %v733_v25 = vadd.f32 %v732_v61, %v718_v22  ;;  %v1233_v4 = vpop.eup %1232  ;;  %v777_v63 = vmul.f32 %v1231_v18, %v776_v6 }
 0x107   : > { %v1235_v40 = vpop.eup %1234  ;;  %v792_v2 = vmul.f32 %v1233_v4, %v791_v0 }
 0x108   : > { %v748_v53 = vadd.f32 %v747_v34, %v733_v25  ;;  %v1237_v1 = vpop.eup %1236  ;;  %v807_v19 = vmul.f32 %v1235_v40, %v806_v46 }
 0x109   : > { %v822_v44 = vmul.f32 %v1237_v1, %v821_v21 }
 0x10a   : > { %v763_v58 = vadd.f32 %v762_v27, %v748_v53 }
 0x10c   : > { %v778_v26 = vadd.f32 %v777_v63, %v763_v58 }
 0x10e   : > { %v793_v55 = vadd.f32 %v792_v2, %v778_v26 }
 0x110   : > { %v808_v30 = vadd.f32 %v807_v19, %v793_v55 }
 0x112   : > { %v823_v57 = vadd.f32 %v822_v44, %v808_v30 }
 0x114   : > { %v824_v13 = vmul.f32 0.5, %v823_v57 }
 0x116   : > { %1238 = vtanh.f32 %v824_v13 }
 0x120   : > { %v1239_v7 = vpop.eup %1238 }
 0x121   : > { %v826_v42 = vadd.f32 1.0, %v1239_v7 }
 0x123   : > { %v827_v29 = vmul.f32 0.5, %v826_v42 }
 0x125   : > { %828 = vst [vmem:[%s281_s23] sm:$0xff] %v827_v29 }
 0x126   : > { %1328 = shalt.err (!%p1325_p9)
}
 0x127   : > { %s1329_s3 = scalar_lea.hbm %s2357_s17, 128  ;;  %s1333_s2 = scalar_lea.hbm %s2604_s28, 384 }
 0x128   : > { %p1330_p2 = scmp.ne.s32.totalorder %s2357_s17, %s1329_s3  ;;  %p1334_p12 = scmp.lt.u32.totalorder %s2357_s17, %s2604_s28 }
 0x129   : > { %p1335_p11 = scmp.lt.u32.totalorder %s1333_s2, %s1329_s3  ;;  %p1337_p10 = scmp.lt.u32.totalorder %s1329_s3, %s2357_s17 }
 0x12a   : > { %p1331_p8 = pnand %p1330_p2, %p2605_p1 }
 0x12b   : > { %p1336_p13 = por %p1335_p11, %p1334_p12 }
 0x12c   : > { %p1332_p4 = pneg %p1331_p8 }
 0x12d   : > { %p1338_p5 = por %p1337_p10, %p1336_p13 }
 0x12f   : > { %p1339_p0 = pnand %p1338_p5, %p1332_p4 }
 0x131   : > { %1342 = shalt.err (!%p1339_p0)
}
 0x132   : > { %1102 = dma.vmem_to_hbm [thread:$0]  (%p2605_p1), %s2359_s7, 128, %s2357_s17, %s830_s10  }
 0x133 PF: > { %s2606_s20 = sld [smem:[#allocation19_spill]]  ;;  %s2607_s21 = sld [smem:[#allocation16_spill]] }
 0x134   : > { %s2608_s11 = sld [smem:[#allocation24_spill]] }
 0x139   : > { %p1129_p6 = scmp.ge.s32.totalorder %s2606_s20, 2  ;;  %s855_s25 = sand.u32 1, %s2607_s21  }
 0x13a   : > { %p2609_p3 = scmp.ne.s32.totalorder %s2608_s11, 0  ;;  %s856_s6 = scalar_lea.sflag [#allocation5], %s855_s25 }
 0x13c   : > { %p1119_p7 = pnand %p1129_p6, %p2609_p3 }
 0x13e   : > { %1372 = dma.done.wait (!%p1119_p7), %s856_s6, 128  }
 0x13f   : > { %1374 = vsyncadd (!%p1119_p7), %s856_s6, 4294967168  ;;  %s2610_s23 = sld [smem:[#allocation21_spill]]  ;;  %s2611_s20 = sld [smem:[#allocation17_spill]] }
 0x140   : > { %s2612_s21 = sld [smem:[#allocation18_spill]]  ;;  %s2613_s22 = sld [smem:[#allocation22_spill]] }
 0x145   : > { %p21_p9 = scmp.ge.s32.totalorder %s2610_s23, 5  }
 0x147   :  { %23 = sbr.rel (!%p21_p9) target bundleno = 14 (0xe), region = 99 }
 0x14e   :  { %861 = vsyncpa [#allocation4], 1 }
 0x14f   :  { %863 = vsyncpa [#allocation4 + $0x1], 1 }
 0x150   :  { %864 = vsyncpa [#allocation5], 1 }
 0x151   :  { %866 = vsyncpa [#allocation5 + $0x1], 1 }
 0x152   :  { %867 = vsyncpa [#allocation6], 1 }
 0x153   :  { %869 = vsyncpa [#allocation6 + $0x1], 1 }
 0x154   :  { %870 = vsyncpa [#allocation8], 1 }

</bundles_post_ra>
